<compile_context>
chip_gen: v7x
topology: tpu7x:2x2x1
jax: 0.10.0
libtpu: 0.0.40
codegen_flags: <defaults>
</compile_context>

<pallas_src>
import jax
import jax.numpy as jnp
from jax.experimental import pallas as pl
from jax.experimental.pallas import tpu as pltpu


# ---------------------------------------------------------------------------
# Kernel 1: sequential LSTM recurrence over time chunks (input projection fused).
# ---------------------------------------------------------------------------
def lstm_recurrent_kernel(emb_ref, wih_ref, b_ref, whh_ref, hout_ref, h_ref, c_ref):
    """Grid = (batch_blocks, time_chunks); one grid step = Tc LSTM timesteps.

    emb_ref : (Tc, Bb, E)  bf16  embedded tokens for this chunk (only streamed input)
    wih_ref : (E, 4H)      bf16  input->gates weights (grid-invariant, VMEM-resident)
    b_ref   : (1, 4H)      f32   b_ih + b_hh (grid-invariant)
    whh_ref : (H, 4H)      bf16  hidden->gates weights (grid-invariant, VMEM-resident)
    hout_ref: (Tc, Bb, H)  bf16  hidden states for this chunk
    h_ref/c_ref : (Bb, H)  f32   recurrent state scratch, persists across time chunks

    NOTE: correctness relies on time being the MINOR grid axis — h/c are reset exactly
    once per batch block at t_chunk == 0.
    """
    t_chunk = pl.program_id(1)

    @pl.when(t_chunk == 0)
    def _():
        h_ref[...] = jnp.zeros_like(h_ref)
        c_ref[...] = jnp.zeros_like(c_ref)

    H = h_ref.shape[-1]
    Tc = emb_ref.shape[0]

    wih = wih_ref[...]
    whh = whh_ref[...]
    bias = b_ref[...]

    def sigmoid_t(x):
        # sigmoid(x) == 0.5 * tanh(0.5 * x) + 0.5 : one EUP op instead of exp + reciprocal;
        # the cheap extra mul/add lands in underused VALU slots.
        return 0.5 * jnp.tanh(0.5 * x) + 0.5

    def step(s, carry):
        h, c = carry
        # Input projection for this timestep: independent of h, so with the partial
        # unroll the scheduler can overlap it with the previous step's EUP/VPU work.
        xg = jnp.dot(emb_ref[s], wih, preferred_element_type=jnp.float32) + bias
        # Only h @ W_hh stays on the serial critical path.
        gates = xg + jnp.dot(h.astype(whh.dtype), whh,
                             preferred_element_type=jnp.float32)
        # Gate order i, f, g, o (PyTorch LSTM convention); elementwise math in f32
        # (v5e has no bf16 VPU/EUP).
        i = sigmoid_t(gates[:, 0 * H:1 * H])
        f = sigmoid_t(gates[:, 1 * H:2 * H])
        g = jnp.tanh(gates[:, 2 * H:3 * H])
        o = sigmoid_t(gates[:, 3 * H:4 * H])
        c_new = f * c + i * g
        h_new = o * jnp.tanh(c_new)
        hout_ref[s] = h_new.astype(hout_ref.dtype)
        return h_new, c_new

    # Partial unroll: keeps LLO scheduling visibility without blowing vregs / spilling
    # at realistic (Bb, H); h/c stay in registers across the chunk.
    h_fin, c_fin = jax.lax.fori_loop(0, Tc, step, (h_ref[...], c_ref[...]),
                                     unroll=min(Tc, 8))
    h_ref[...] = h_fin
    c_ref[...] = c_fin


# ---------------------------------------------------------------------------
# Kernel 2: output projection fused with the module's permute(0, 2, 1).
# ---------------------------------------------------------------------------
def output_projection_kernel(w_ref, h_ref, b_ref, out_ref):
    """(tn, H) @ (H, T) + (tn, 1)  ->  (tn, T) tile of the (B, V, T) output.

    w_ref : (tn, H) bf16   tile of W_out^T
    h_ref : (H, T)  bf16   hidden states of one batch row, already (H, T)-major
    b_ref : (tn, 1) f32    output bias column
    """
    out_ref[...] = (jnp.dot(w_ref[...], h_ref[...],
                            preferred_element_type=jnp.float32)
                    + b_ref[...]).astype(out_ref.dtype)


# ---------------------------------------------------------------------------
# Tiling helpers
# ---------------------------------------------------------------------------
def _largest_divisor_leq(n, cap):
    for d in range(min(n, cap), 0, -1):
        if n % d == 0:
            return d
    return 1


def _pick_batch_block(B, batch_block):
    """Pick a batch block: >=2 blocks when possible (v7x 2-TC split), multiple of 8."""
    if batch_block is not None:
        Bb = _largest_divisor_leq(B, batch_block)
    else:
        Bb = B
        if B % 16 == 0:          # split only if each half stays a multiple of 8 sublanes
            Bb = B // 2
        while Bb > 64 and Bb % 16 == 0:   # keep per-block VMEM footprint bounded
            Bb //= 2
    if Bb < B and Bb % 8 != 0:
        Bb = B                   # (8,128) rule: sub-8 sublane blocks only legal when Bb == B
    return Bb


def _pick_vocab_tile(V, cap=512):
    """Largest divisor of V <= cap that is a multiple of 8 (sublane-aligned)."""
    # TODO(synk): for odd vocab sizes, pad V up to a multiple of 256 instead of falling
    # back to the full vocab (which can be VMEM-heavy for huge V).
    for d in range(min(V, cap), 7, -1):
        if V % d == 0 and d % 8 == 0:
            return d
    return V


# Explicit scoped-VMEM budgets. Recurrent kernel at realistic sizes
# (H=E=1024, Bb<=64, Tc=16, double-buffered weights) needs ~40 MiB; 48 MiB fits
# v5e/v6e (128 MiB) and v7x (64 MiB physical) with headroom.
_VMEM_LIMIT_RECURRENT = 48 * 1024 * 1024
_VMEM_LIMIT_PROJECTION = 32 * 1024 * 1024


# ---------------------------------------------------------------------------
# Wrapper
# ---------------------------------------------------------------------------
def lm_lstm_forward(ids, params, *, compute_dtype=jnp.bfloat16,
                    time_block=16, batch_block=None, logits_dtype=jnp.float32):
    """ids: (B, T) int32 token ids. Returns logits (B, V, T), matching the
    PyTorch module's `.permute(0, 2, 1)` output layout."""
    emb_table = params["emb"]
    B, T = ids.shape
    E = emb_table.shape[1]
    H = params["w_hh"].shape[0]
    V = params["w_out"].shape[1]

    Tc = _largest_divisor_leq(T, time_block)
    Bb = _pick_batch_block(B, batch_block)
    nb = B // Bb
    cd = compute_dtype

    w_ih = params["w_ih"].astype(cd)
    w_hh = params["w_hh"].astype(cd)

    # ---- Embedding lookup, emitted time-major; only these bf16 embeddings are streamed
    # into the recurrent kernel (the input projection itself is fused in-kernel).
    emb_t = jnp.take(emb_table, ids.T, axis=0).astype(cd)            # (T, B, E)

    # ---- Sequential LSTM recurrence over time chunks (emits hidden states only).
    hout = pl.pallas_call(
        lstm_recurrent_kernel,
        out_shape=jax.ShapeDtypeStruct((T, B, H), cd),
        grid_spec=pltpu.PrefetchScalarGridSpec(
            num_scalar_prefetch=0,
            # Time MUST stay the minor grid axis (h/c scratch reset at t_chunk == 0).
            grid=(nb, T // Tc),
            in_specs=[
                pl.BlockSpec((Tc, Bb, E), lambda b, t: (t, b, 0)),
                pl.BlockSpec((E, 4 * H), lambda b, t: (0, 0)),   # grid-invariant
                pl.BlockSpec((1, 4 * H), lambda b, t: (0, 0)),   # grid-invariant
                pl.BlockSpec((H, 4 * H), lambda b, t: (0, 0)),   # grid-invariant
            ],
            out_specs=pl.BlockSpec((Tc, Bb, H), lambda b, t: (t, b, 0)),
            scratch_shapes=[
                pltpu.VMEM((Bb, H), jnp.float32),   # h state
                pltpu.VMEM((Bb, H), jnp.float32),   # c state
            ],
        ),
        compiler_params=pltpu.CompilerParams(
            dimension_semantics=("parallel", "arbitrary"),  # time is a recurrence
            vmem_limit_bytes=_VMEM_LIMIT_RECURRENT),
    )(emb_t, w_ih, params["b"], w_hh)

    # ---- Output projection fused with permute(0,2,1): writes (B, V, T) directly.
    # Vocab tile is the OUTER grid axis so each W_out^T tile is fetched once and reused
    # across all (batch, time); the small (T,B,H)->(B,H,T) transpose of the hidden states
    # is done in XLA (negligible vs the (B,V,T) logits traffic).
    w_out_t = params["w_out"].T.astype(cd)                           # (V, H)
    b_col = params["b_out"].reshape(V, 1)                            # (V, 1)
    h_bht = jnp.transpose(hout, (1, 2, 0))                           # (B, H, T)

    tn = _pick_vocab_tile(V)
    logits = pl.pallas_call(
        output_projection_kernel,
        # TODO(synk): emit bf16 logits here if downstream tolerance allows (halves the
        # dominant HBM write of this memory-bound stage).
        out_shape=jax.ShapeDtypeStruct((B, V, T), logits_dtype),
        grid_spec=pltpu.PrefetchScalarGridSpec(
            num_scalar_prefetch=0,
            grid=(V // tn, B),
            in_specs=[
                pl.BlockSpec((tn, H), lambda j, b: (j, 0)),
                pl.BlockSpec((None, H, T), lambda j, b: (b, 0, 0)),
                pl.BlockSpec((tn, 1), lambda j, b: (j, 0)),
            ],
            out_specs=pl.BlockSpec((None, tn, T), lambda j, b: (b, j, 0)),
        ),
        compiler_params=pltpu.CompilerParams(
            dimension_semantics=("parallel", "parallel"),
            vmem_limit_bytes=_VMEM_LIMIT_PROJECTION),
    )(w_out_t, h_bht, b_col)

    return logits                                                    # (B, V, T)


# ---------------------------------------------------------------------------
# Parameters and pure-JAX reference (mirrors the kernel's bf16-matmul policy).
# ---------------------------------------------------------------------------
def init_params(key, emb_size, hidden_size, output_size, pad_index=0):
    """Deterministic synthetic parameters matching nn.Embedding / nn.LSTM / nn.Linear.

    NOTE (porting): real PyTorch LSTM weights are (4H, E)/(4H, H); transpose them to the
    (E, 4H)/(H, 4H) layout used here, preserving the i,f,g,o column order."""
    k = jax.random.split(key, 8)
    kH = 1.0 / jnp.sqrt(hidden_size)

    emb = jax.random.normal(k[0], (output_size, emb_size), jnp.float32)
    emb = emb.at[pad_index].set(0.0)                      # padding_idx row is zero

    w_ih = jax.random.uniform(k[1], (emb_size, 4 * hidden_size), jnp.float32, -kH, kH)
    w_hh = jax.random.uniform(k[2], (hidden_size, 4 * hidden_size), jnp.float32, -kH, kH)
    b_ih = jax.random.uniform(k[3], (1, 4 * hidden_size), jnp.float32, -kH, kH)
    b_hh = jax.random.uniform(k[4], (1, 4 * hidden_size), jnp.float32, -kH, kH)

    w_out = jax.random.uniform(k[5], (hidden_size, output_size), jnp.float32, -kH, kH)
    b_out = jax.random.uniform(k[6], (1, output_size), jnp.float32, -kH, kH)

    return {
        "emb": emb,
        "w_ih": w_ih,
        "w_hh": w_hh,
        "b": b_ih + b_hh,      # PyTorch adds b_ih and b_hh
        "w_out": w_out,
        "b_out": b_out,
    }


def reference_forward(ids, params, compute_dtype=jnp.bfloat16):
    """Pure-JAX lax.scan reference using the same decomposition and dtype casts
    (but jax.nn.sigmoid, so the in-kernel tanh-based sigmoid is cross-checked)."""
    cd = compute_dtype
    B, T = ids.shape
    E = params["emb"].shape[1]
    H = params["w_hh"].shape[0]

    emb_t = jnp.take(params["emb"], ids.T, axis=0).astype(cd)        # (T, B, E)
    xg = (jnp.dot(emb_t.reshape(T * B, E), params["w_ih"].astype(cd),
                  preferred_element_type=jnp.float32)
          + params["b"]).reshape(T, B, 4 * H)
    w_hh = params["w_hh"].astype(cd)

    def step(carry, xg_t):
        h, c = carry
        gates = xg_t + jnp.dot(h.astype(cd), w_hh,
                               preferred_element_type=jnp.float32)
        i = jax.nn.sigmoid(gates[:, 0 * H:1 * H])
        f = jax.nn.sigmoid(gates[:, 1 * H:2 * H])
        g = jnp.tanh(gates[:, 2 * H:3 * H])
        o = jax.nn.sigmoid(gates[:, 3 * H:4 * H])
        c = f * c + i * g
        h = o * jnp.tanh(c)
        return (h, c), h.astype(cd)

    h0 = jnp.zeros((B, H), jnp.float32)
    (_, _), hs = jax.lax.scan(step, (h0, h0), xg)                    # (T, B, H) bf16
    logits = (jnp.dot(hs.reshape(T * B, H), params["w_out"].astype(cd),
                      preferred_element_type=jnp.float32)
              + params["b_out"]).reshape(T, B, -1)
    return jnp.transpose(logits, (1, 2, 0))                          # (B, V, T)


if __name__ == "__main__":
    emb_size, hidden_size, output_size = 16, 32, 64
    B, T = 2, 8

    key = jax.random.PRNGKey(0)
    k_param, k_ids = jax.random.split(key)
    params = init_params(k_param, emb_size, hidden_size, output_size, pad_index=0)
    ids = jax.random.randint(k_ids, (B, T), 0, output_size, dtype=jnp.int32)

    out = jax.block_until_ready(lm_lstm_forward(ids, params))
    ref = jax.block_until_ready(reference_forward(ids, params))

    assert out.shape == (B, output_size, T), out.shape
    max_err = jnp.max(jnp.abs(out - ref))
    assert jnp.allclose(out, ref, rtol=2e-3, atol=2e-3), f"mismatch vs reference, max err {max_err}"
    print("KERNEL_OK")
</pallas_src>

<mosaic_0001>
module attributes {stable_mosaic.version = 11 : i64} {
  func.func @lstm_recurrent_kernel(%arg0: i32, %arg1: i32, %arg2: memref<8x2x16xbf16, #tpu.memory_space<vmem>>, %arg3: memref<16x128xbf16, #tpu.memory_space<vmem>>, %arg4: memref<1x128xf32, #tpu.memory_space<vmem>>, %arg5: memref<32x128xbf16, #tpu.memory_space<vmem>>, %arg6: memref<8x2x32xbf16, #tpu.memory_space<vmem>>, %arg7: memref<2x32xf32, #tpu.memory_space<vmem>>, %arg8: memref<2x32xf32, #tpu.memory_space<vmem>>) attributes {dimension_semantics = [#tpu.dimension_semantics<parallel>, #tpu.dimension_semantics<arbitrary>], iteration_bounds = array<i64: 1, 1>, scalar_prefetch = 0 : i64, scratch_operands = 2 : i64, tpu.core_type = #tpu.core_type<tc>, window_params = [{transform_indices = @transform_0, window_bounds = array<i64: 8, 2, 16>}, {pipeline_mode = #tpu.pipeline_mode<synchronous>, transform_indices = @transform_1, window_bounds = array<i64: 16, 128>}, {pipeline_mode = #tpu.pipeline_mode<synchronous>, transform_indices = @transform_2, window_bounds = array<i64: 1, 128>}, {pipeline_mode = #tpu.pipeline_mode<synchronous>, transform_indices = @transform_3, window_bounds = array<i64: 32, 128>}, {transform_indices = @transform_4, window_bounds = array<i64: 8, 2, 32>}]} {
    %c0_i32 = arith.constant 0 : i32
    %0 = arith.cmpi eq, %arg1, %c0_i32 : i32
    %1 = arith.extui %0 : i1 to i32
    %c0_i32_0 = arith.constant 0 : i32
    %2 = arith.cmpi ne, %1, %c0_i32_0 : i32
    scf.if %2 {
      %cst_134 = arith.constant 0.000000e+00 : f32
      %370 = vector.broadcast %cst_134 : f32 to vector<2x32xf32>
      %c0_135 = arith.constant 0 : index
      %c0_136 = arith.constant 0 : index
      %371 = vector.load %arg7[%c0_135, %c0_136] : memref<2x32xf32, #tpu.memory_space<vmem>>, vector<2x32xf32>
      tpu.vector_store %arg7[%c0_135, %c0_136], %370 {strides = array<i32>} : memref<2x32xf32, #tpu.memory_space<vmem>>, vector<2x32xf32>,
      %cst_137 = arith.constant 0.000000e+00 : f32
      %372 = vector.broadcast %cst_137 : f32 to vector<2x32xf32>
      %c0_138 = arith.constant 0 : index
      %c0_139 = arith.constant 0 : index
      %373 = vector.load %arg8[%c0_138, %c0_139] : memref<2x32xf32, #tpu.memory_space<vmem>>, vector<2x32xf32>
      tpu.vector_store %arg8[%c0_138, %c0_139], %372 {strides = array<i32>} : memref<2x32xf32, #tpu.memory_space<vmem>>, vector<2x32xf32>,
    } else {
    }
    %c0 = arith.constant 0 : index
    %c0_1 = arith.constant 0 : index
    %3 = vector.load %arg3[%c0, %c0_1] : memref<16x128xbf16, #tpu.memory_space<vmem>>, vector<16x128xbf16>
    %c0_2 = arith.constant 0 : index
    %c0_3 = arith.constant 0 : index
    %4 = vector.load %arg5[%c0_2, %c0_3] : memref<32x128xbf16, #tpu.memory_space<vmem>>, vector<32x128xbf16>
    %c0_4 = arith.constant 0 : index
    %c0_5 = arith.constant 0 : index
    %5 = vector.load %arg4[%c0_4, %c0_5] : memref<1x128xf32, #tpu.memory_space<vmem>>, vector<1x128xf32>
    %c0_6 = arith.constant 0 : index
    %c0_7 = arith.constant 0 : index
    %6 = vector.load %arg7[%c0_6, %c0_7] : memref<2x32xf32, #tpu.memory_space<vmem>>, vector<2x32xf32>
    %c0_8 = arith.constant 0 : index
    %c0_9 = arith.constant 0 : index
    %7 = vector.load %arg8[%c0_8, %c0_9] : memref<2x32xf32, #tpu.memory_space<vmem>>, vector<2x32xf32>
    %c0_i32_10 = arith.constant 0 : i32
    %8 = arith.index_cast %c0_i32_10 : i32 to index
    %c0_11 = arith.constant 0 : index
    %c0_12 = arith.constant 0 : index
    %9 = vector.load %arg2[%8, %c0_11, %c0_12] : memref<8x2x16xbf16, #tpu.memory_space<vmem>>, vector<1x2x16xbf16>
    %10 = vector.shape_cast %9 : vector<1x2x16xbf16> to vector<2x16xbf16>
    %cst = arith.constant dense<0.000000e+00> : vector<2x128xf32>
    %11 = tpu.matmul %10, %3, %cst {dimension_numbers = #tpu.dot_dimension_numbers<[1], [0], [0], [1], [0, 0, 1, 1], [], []>} : vector<2x16xbf16>, vector<16x128xbf16>, vector<2x128xf32> -> vector<2x128xf32>
    %12 = vector.broadcast %5 : vector<1x128xf32> to vector<2x128xf32>
    %13 = arith.addf %11, %12 : vector<2x128xf32>
    %14 = arith.truncf %6 : vector<2x32xf32> to vector<2x32xbf16>
    %cst_13 = arith.constant dense<0.000000e+00> : vector<2x128xf32>
    %15 = tpu.matmul %14, %4, %cst_13 {dimension_numbers = #tpu.dot_dimension_numbers<[1], [0], [0], [1], [0, 0, 1, 1], [], []>} : vector<2x32xbf16>, vector<32x128xbf16>, vector<2x128xf32> -> vector<2x128xf32>
    %16 = arith.addf %13, %15 : vector<2x128xf32>
    %17 = vector.extract_strided_slice %16 {offsets = [0, 0], sizes = [2, 32], strides = [1, 1]} : vector<2x128xf32> to vector<2x32xf32>
    %cst_14 = arith.constant 5.000000e-01 : f32
    %18 = vector.broadcast %cst_14 : f32 to vector<2x32xf32>
    %19 = arith.mulf %18, %17 : vector<2x32xf32>
    %20 = math.tanh %19 : vector<2x32xf32>
    %cst_15 = arith.constant 5.000000e-01 : f32
    %21 = vector.broadcast %cst_15 : f32 to vector<2x32xf32>
    %22 = arith.mulf %21, %20 : vector<2x32xf32>
    %cst_16 = arith.constant 5.000000e-01 : f32
    %23 = vector.broadcast %cst_16 : f32 to vector<2x32xf32>
    %24 = arith.addf %22, %23 : vector<2x32xf32>
    %25 = vector.extract_strided_slice %16 {offsets = [0, 32], sizes = [2, 32], strides = [1, 1]} : vector<2x128xf32> to vector<2x32xf32>
    %cst_17 = arith.constant 5.000000e-01 : f32
    %26 = vector.broadcast %cst_17 : f32 to vector<2x32xf32>
    %27 = arith.mulf %26, %25 : vector<2x32xf32>
    %28 = math.tanh %27 : vector<2x32xf32>
    %cst_18 = arith.constant 5.000000e-01 : f32
    %29 = vector.broadcast %cst_18 : f32 to vector<2x32xf32>
    %30 = arith.mulf %29, %28 : vector<2x32xf32>
    %cst_19 = arith.constant 5.000000e-01 : f32
    %31 = vector.broadcast %cst_19 : f32 to vector<2x32xf32>
    %32 = arith.addf %30, %31 : vector<2x32xf32>
    %33 = vector.extract_strided_slice %16 {offsets = [0, 64], sizes = [2, 32], strides = [1, 1]} : vector<2x128xf32> to vector<2x32xf32>
    %34 = math.tanh %33 : vector<2x32xf32>
    %35 = vector.extract_strided_slice %16 {offsets = [0, 96], sizes = [2, 32], strides = [1, 1]} : vector<2x128xf32> to vector<2x32xf32>
    %cst_20 = arith.constant 5.000000e-01 : f32
    %36 = vector.broadcast %cst_20 : f32 to vector<2x32xf32>
    %37 = arith.mulf %36, %35 : vector<2x32xf32>
    %38 = math.tanh %37 : vector<2x32xf32>
    %cst_21 = arith.constant 5.000000e-01 : f32
    %39 = vector.broadcast %cst_21 : f32 to vector<2x32xf32>
    %40 = arith.mulf %39, %38 : vector<2x32xf32>
    %cst_22 = arith.constant 5.000000e-01 : f32
    %41 = vector.broadcast %cst_22 : f32 to vector<2x32xf32>
    %42 = arith.addf %40, %41 : vector<2x32xf32>
    %43 = arith.mulf %32, %7 : vector<2x32xf32>
    %44 = arith.mulf %24, %34 : vector<2x32xf32>
    %45 = arith.addf %43, %44 : vector<2x32xf32>
    %46 = math.tanh %45 : vector<2x32xf32>
    %47 = arith.mulf %42, %46 : vector<2x32xf32>
    %48 = arith.truncf %47 : vector<2x32xf32> to vector<2x32xbf16>
    %49 = arith.index_cast %c0_i32_10 : i32 to index
    %c0_23 = arith.constant 0 : index
    %c0_24 = arith.constant 0 : index
    %50 = vector.load %arg6[%49, %c0_23, %c0_24] : memref<8x2x32xbf16, #tpu.memory_space<vmem>>, vector<1x2x32xbf16>
    %51 = vector.shape_cast %50 : vector<1x2x32xbf16> to vector<2x32xbf16>
    %52 = vector.shape_cast %48 : vector<2x32xbf16> to vector<1x2x32xbf16>
    tpu.vector_store %arg6[%49, %c0_23, %c0_24], %52 {strides = array<i32>} : memref<8x2x32xbf16, #tpu.memory_space<vmem>>, vector<1x2x32xbf16>,
    %c1_i32 = arith.constant 1 : i32
    %53 = arith.index_cast %c1_i32 : i32 to index
    %c0_25 = arith.constant 0 : index
    %c0_26 = arith.constant 0 : index
    %54 = vector.load %arg2[%53, %c0_25, %c0_26] : memref<8x2x16xbf16, #tpu.memory_space<vmem>>, vector<1x2x16xbf16>
    %55 = vector.shape_cast %54 : vector<1x2x16xbf16> to vector<2x16xbf16>
    %cst_27 = arith.constant dense<0.000000e+00> : vector<2x128xf32>
    %56 = tpu.matmul %55, %3, %cst_27 {dimension_numbers = #tpu.dot_dimension_numbers<[1], [0], [0], [1], [0, 0, 1, 1], [], []>} : vector<2x16xbf16>, vector<16x128xbf16>, vector<2x128xf32> -> vector<2x128xf32>
    %57 = vector.broadcast %5 : vector<1x128xf32> to vector<2x128xf32>
    %58 = arith.addf %56, %57 : vector<2x128xf32>
    %59 = arith.truncf %47 : vector<2x32xf32> to vector<2x32xbf16>
    %cst_28 = arith.constant dense<0.000000e+00> : vector<2x128xf32>
    %60 = tpu.matmul %59, %4, %cst_28 {dimension_numbers = #tpu.dot_dimension_numbers<[1], [0], [0], [1], [0, 0, 1, 1], [], []>} : vector<2x32xbf16>, vector<32x128xbf16>, vector<2x128xf32> -> vector<2x128xf32>
    %61 = arith.addf %58, %60 : vector<2x128xf32>
    %62 = vector.extract_strided_slice %61 {offsets = [0, 0], sizes = [2, 32], strides = [1, 1]} : vector<2x128xf32> to vector<2x32xf32>
    %cst_29 = arith.constant 5.000000e-01 : f32
    %63 = vector.broadcast %cst_29 : f32 to vector<2x32xf32>
    %64 = arith.mulf %63, %62 : vector<2x32xf32>
    %65 = math.tanh %64 : vector<2x32xf32>
    %cst_30 = arith.constant 5.000000e-01 : f32
    %66 = vector.broadcast %cst_30 : f32 to vector<2x32xf32>
    %67 = arith.mulf %66, %65 : vector<2x32xf32>
    %cst_31 = arith.constant 5.000000e-01 : f32
    %68 = vector.broadcast %cst_31 : f32 to vector<2x32xf32>
    %69 = arith.addf %67, %68 : vector<2x32xf32>
    %70 = vector.extract_strided_slice %61 {offsets = [0, 32], sizes = [2, 32], strides = [1, 1]} : vector<2x128xf32> to vector<2x32xf32>
    %cst_32 = arith.constant 5.000000e-01 : f32
    %71 = vector.broadcast %cst_32 : f32 to vector<2x32xf32>
    %72 = arith.mulf %71, %70 : vector<2x32xf32>
    %73 = math.tanh %72 : vector<2x32xf32>
    %cst_33 = arith.constant 5.000000e-01 : f32
    %74 = vector.broadcast %cst_33 : f32 to vector<2x32xf32>
    %75 = arith.mulf %74, %73 : vector<2x32xf32>
    %cst_34 = arith.constant 5.000000e-01 : f32
    %76 = vector.broadcast %cst_34 : f32 to vector<2x32xf32>
    %77 = arith.addf %75, %76 : vector<2x32xf32>
    %78 = vector.extract_strided_slice %61 {offsets = [0, 64], sizes = [2, 32], strides = [1, 1]} : vector<2x128xf32> to vector<2x32xf32>
    %79 = math.tanh %78 : vector<2x32xf32>
    %80 = vector.extract_strided_slice %61 {offsets = [0, 96], sizes = [2, 32], strides = [1, 1]} : vector<2x128xf32> to vector<2x32xf32>
    %cst_35 = arith.constant 5.000000e-01 : f32
    %81 = vector.broadcast %cst_35 : f32 to vector<2x32xf32>
    %82 = arith.mulf %81, %80 : vector<2x32xf32>
    %83 = math.tanh %82 : vector<2x32xf32>
    %cst_36 = arith.constant 5.000000e-01 : f32
    %84 = vector.broadcast %cst_36 : f32 to vector<2x32xf32>
    %85 = arith.mulf %84, %83 : vector<2x32xf32>
    %cst_37 = arith.constant 5.000000e-01 : f32
    %86 = vector.broadcast %cst_37 : f32 to vector<2x32xf32>
    %87 = arith.addf %85, %86 : vector<2x32xf32>
    %88 = arith.mulf %77, %45 : vector<2x32xf32>
    %89 = arith.mulf %69, %79 : vector<2x32xf32>
    %90 = arith.addf %88, %89 : vector<2x32xf32>
    %91 = math.tanh %90 : vector<2x32xf32>
    %92 = arith.mulf %87, %91 : vector<2x32xf32>
    %93 = arith.truncf %92 : vector<2x32xf32> to vector<2x32xbf16>
    %94 = arith.index_cast %c1_i32 : i32 to index
    %c0_38 = arith.constant 0 : index
    %c0_39 = arith.constant 0 : index
    %95 = vector.load %arg6[%94, %c0_38, %c0_39] : memref<8x2x32xbf16, #tpu.memory_space<vmem>>, vector<1x2x32xbf16>
    %96 = vector.shape_cast %95 : vector<1x2x32xbf16> to vector<2x32xbf16>
    %97 = vector.shape_cast %93 : vector<2x32xbf16> to vector<1x2x32xbf16>
    tpu.vector_store %arg6[%94, %c0_38, %c0_39], %97 {strides = array<i32>} : memref<8x2x32xbf16, #tpu.memory_space<vmem>>, vector<1x2x32xbf16>,
    %c2_i32 = arith.constant 2 : i32
    %98 = arith.index_cast %c2_i32 : i32 to index
    %c0_40 = arith.constant 0 : index
    %c0_41 = arith.constant 0 : index
    %99 = vector.load %arg2[%98, %c0_40, %c0_41] : memref<8x2x16xbf16, #tpu.memory_space<vmem>>, vector<1x2x16xbf16>
    %100 = vector.shape_cast %99 : vector<1x2x16xbf16> to vector<2x16xbf16>
    %cst_42 = arith.constant dense<0.000000e+00> : vector<2x128xf32>
    %101 = tpu.matmul %100, %3, %cst_42 {dimension_numbers = #tpu.dot_dimension_numbers<[1], [0], [0], [1], [0, 0, 1, 1], [], []>} : vector<2x16xbf16>, vector<16x128xbf16>, vector<2x128xf32> -> vector<2x128xf32>
    %102 = vector.broadcast %5 : vector<1x128xf32> to vector<2x128xf32>
    %103 = arith.addf %101, %102 : vector<2x128xf32>
    %104 = arith.truncf %92 : vector<2x32xf32> to vector<2x32xbf16>
    %cst_43 = arith.constant dense<0.000000e+00> : vector<2x128xf32>
    %105 = tpu.matmul %104, %4, %cst_43 {dimension_numbers = #tpu.dot_dimension_numbers<[1], [0], [0], [1], [0, 0, 1, 1], [], []>} : vector<2x32xbf16>, vector<32x128xbf16>, vector<2x128xf32> -> vector<2x128xf32>
    %106 = arith.addf %103, %105 : vector<2x128xf32>
    %107 = vector.extract_strided_slice %106 {offsets = [0, 0], sizes = [2, 32], strides = [1, 1]} : vector<2x128xf32> to vector<2x32xf32>
    %cst_44 = arith.constant 5.000000e-01 : f32
    %108 = vector.broadcast %cst_44 : f32 to vector<2x32xf32>
    %109 = arith.mulf %108, %107 : vector<2x32xf32>
    %110 = math.tanh %109 : vector<2x32xf32>
    %cst_45 = arith.constant 5.000000e-01 : f32
    %111 = vector.broadcast %cst_45 : f32 to vector<2x32xf32>
    %112 = arith.mulf %111, %110 : vector<2x32xf32>
    %cst_46 = arith.constant 5.000000e-01 : f32
    %113 = vector.broadcast %cst_46 : f32 to vector<2x32xf32>
    %114 = arith.addf %112, %113 : vector<2x32xf32>
    %115 = vector.extract_strided_slice %106 {offsets = [0, 32], sizes = [2, 32], strides = [1, 1]} : vector<2x128xf32> to vector<2x32xf32>
    %cst_47 = arith.constant 5.000000e-01 : f32
    %116 = vector.broadcast %cst_47 : f32 to vector<2x32xf32>
    %117 = arith.mulf %116, %115 : vector<2x32xf32>
    %118 = math.tanh %117 : vector<2x32xf32>
    %cst_48 = arith.constant 5.000000e-01 : f32
    %119 = vector.broadcast %cst_48 : f32 to vector<2x32xf32>
    %120 = arith.mulf %119, %118 : vector<2x32xf32>
    %cst_49 = arith.constant 5.000000e-01 : f32
    %121 = vector.broadcast %cst_49 : f32 to vector<2x32xf32>
    %122 = arith.addf %120, %121 : vector<2x32xf32>
    %123 = vector.extract_strided_slice %106 {offsets = [0, 64], sizes = [2, 32], strides = [1, 1]} : vector<2x128xf32> to vector<2x32xf32>
    %124 = math.tanh %123 : vector<2x32xf32>
    %125 = vector.extract_strided_slice %106 {offsets = [0, 96], sizes = [2, 32], strides = [1, 1]} : vector<2x128xf32> to vector<2x32xf32>
    %cst_50 = arith.constant 5.000000e-01 : f32
    %126 = vector.broadcast %cst_50 : f32 to vector<2x32xf32>
    %127 = arith.mulf %126, %125 : vector<2x32xf32>
    %128 = math.tanh %127 : vector<2x32xf32>
    %cst_51 = arith.constant 5.000000e-01 : f32
    %129 = vector.broadcast %cst_51 : f32 to vector<2x32xf32>
    %130 = arith.mulf %129, %128 : vector<2x32xf32>
    %cst_52 = arith.constant 5.000000e-01 : f32
    %131 = vector.broadcast %cst_52 : f32 to vector<2x32xf32>
    %132 = arith.addf %130, %131 : vector<2x32xf32>
    %133 = arith.mulf %122, %90 : vector<2x32xf32>
    %134 = arith.mulf %114, %124 : vector<2x32xf32>
    %135 = arith.addf %133, %134 : vector<2x32xf32>
    %136 = math.tanh %135 : vector<2x32xf32>
    %137 = arith.mulf %132, %136 : vector<2x32xf32>
    %138 = arith.truncf %137 : vector<2x32xf32> to vector<2x32xbf16>
    %139 = arith.index_cast %c2_i32 : i32 to index
    %c0_53 = arith.constant 0 : index
    %c0_54 = arith.constant 0 : index
    %140 = vector.load %arg6[%139, %c0_53, %c0_54] : memref<8x2x32xbf16, #tpu.memory_space<vmem>>, vector<1x2x32xbf16>
    %141 = vector.shape_cast %140 : vector<1x2x32xbf16> to vector<2x32xbf16>
    %142 = vector.shape_cast %138 : vector<2x32xbf16> to vector<1x2x32xbf16>
    tpu.vector_store %arg6[%139, %c0_53, %c0_54], %142 {strides = array<i32>} : memref<8x2x32xbf16, #tpu.memory_space<vmem>>, vector<1x2x32xbf16>,
    %c3_i32 = arith.constant 3 : i32
    %143 = arith.index_cast %c3_i32 : i32 to index
    %c0_55 = arith.constant 0 : index
    %c0_56 = arith.constant 0 : index
    %144 = vector.load %arg2[%143, %c0_55, %c0_56] : memref<8x2x16xbf16, #tpu.memory_space<vmem>>, vector<1x2x16xbf16>
    %145 = vector.shape_cast %144 : vector<1x2x16xbf16> to vector<2x16xbf16>
    %cst_57 = arith.constant dense<0.000000e+00> : vector<2x128xf32>
    %146 = tpu.matmul %145, %3, %cst_57 {dimension_numbers = #tpu.dot_dimension_numbers<[1], [0], [0], [1], [0, 0, 1, 1], [], []>} : vector<2x16xbf16>, vector<16x128xbf16>, vector<2x128xf32> -> vector<2x128xf32>
    %147 = vector.broadcast %5 : vector<1x128xf32> to vector<2x128xf32>
    %148 = arith.addf %146, %147 : vector<2x128xf32>
    %149 = arith.truncf %137 : vector<2x32xf32> to vector<2x32xbf16>
    %cst_58 = arith.constant dense<0.000000e+00> : vector<2x128xf32>
    %150 = tpu.matmul %149, %4, %cst_58 {dimension_numbers = #tpu.dot_dimension_numbers<[1], [0], [0], [1], [0, 0, 1, 1], [], []>} : vector<2x32xbf16>, vector<32x128xbf16>, vector<2x128xf32> -> vector<2x128xf32>
    %151 = arith.addf %148, %150 : vector<2x128xf32>
    %152 = vector.extract_strided_slice %151 {offsets = [0, 0], sizes = [2, 32], strides = [1, 1]} : vector<2x128xf32> to vector<2x32xf32>
    %cst_59 = arith.constant 5.000000e-01 : f32
    %153 = vector.broadcast %cst_59 : f32 to vector<2x32xf32>
    %154 = arith.mulf %153, %152 : vector<2x32xf32>
    %155 = math.tanh %154 : vector<2x32xf32>
    %cst_60 = arith.constant 5.000000e-01 : f32
    %156 = vector.broadcast %cst_60 : f32 to vector<2x32xf32>
    %157 = arith.mulf %156, %155 : vector<2x32xf32>
    %cst_61 = arith.constant 5.000000e-01 : f32
    %158 = vector.broadcast %cst_61 : f32 to vector<2x32xf32>
    %159 = arith.addf %157, %158 : vector<2x32xf32>
    %160 = vector.extract_strided_slice %151 {offsets = [0, 32], sizes = [2, 32], strides = [1, 1]} : vector<2x128xf32> to vector<2x32xf32>
    %cst_62 = arith.constant 5.000000e-01 : f32
    %161 = vector.broadcast %cst_62 : f32 to vector<2x32xf32>
    %162 = arith.mulf %161, %160 : vector<2x32xf32>
    %163 = math.tanh %162 : vector<2x32xf32>
    %cst_63 = arith.constant 5.000000e-01 : f32
    %164 = vector.broadcast %cst_63 : f32 to vector<2x32xf32>
    %165 = arith.mulf %164, %163 : vector<2x32xf32>
    %cst_64 = arith.constant 5.000000e-01 : f32
    %166 = vector.broadcast %cst_64 : f32 to vector<2x32xf32>
    %167 = arith.addf %165, %166 : vector<2x32xf32>
    %168 = vector.extract_strided_slice %151 {offsets = [0, 64], sizes = [2, 32], strides = [1, 1]} : vector<2x128xf32> to vector<2x32xf32>
    %169 = math.tanh %168 : vector<2x32xf32>
    %170 = vector.extract_strided_slice %151 {offsets = [0, 96], sizes = [2, 32], strides = [1, 1]} : vector<2x128xf32> to vector<2x32xf32>
    %cst_65 = arith.constant 5.000000e-01 : f32
    %171 = vector.broadcast %cst_65 : f32 to vector<2x32xf32>
    %172 = arith.mulf %171, %170 : vector<2x32xf32>
    %173 = math.tanh %172 : vector<2x32xf32>
    %cst_66 = arith.constant 5.000000e-01 : f32
    %174 = vector.broadcast %cst_66 : f32 to vector<2x32xf32>
    %175 = arith.mulf %174, %173 : vector<2x32xf32>
    %cst_67 = arith.constant 5.000000e-01 : f32
    %176 = vector.broadcast %cst_67 : f32 to vector<2x32xf32>
    %177 = arith.addf %175, %176 : vector<2x32xf32>
    %178 = arith.mulf %167, %135 : vector<2x32xf32>
    %179 = arith.mulf %159, %169 : vector<2x32xf32>
    %180 = arith.addf %178, %179 : vector<2x32xf32>
    %181 = math.tanh %180 : vector<2x32xf32>
    %182 = arith.mulf %177, %181 : vector<2x32xf32>
    %183 = arith.truncf %182 : vector<2x32xf32> to vector<2x32xbf16>
    %184 = arith.index_cast %c3_i32 : i32 to index
    %c0_68 = arith.constant 0 : index
    %c0_69 = arith.constant 0 : index
    %185 = vector.load %arg6[%184, %c0_68, %c0_69] : memref<8x2x32xbf16, #tpu.memory_space<vmem>>, vector<1x2x32xbf16>
    %186 = vector.shape_cast %185 : vector<1x2x32xbf16> to vector<2x32xbf16>
    %187 = vector.shape_cast %183 : vector<2x32xbf16> to vector<1x2x32xbf16>
    tpu.vector_store %arg6[%184, %c0_68, %c0_69], %187 {strides = array<i32>} : memref<8x2x32xbf16, #tpu.memory_space<vmem>>, vector<1x2x32xbf16>,
    %c4_i32 = arith.constant 4 : i32
    %188 = arith.index_cast %c4_i32 : i32 to index
    %c0_70 = arith.constant 0 : index
    %c0_71 = arith.constant 0 : index
    %189 = vector.load %arg2[%188, %c0_70, %c0_71] : memref<8x2x16xbf16, #tpu.memory_space<vmem>>, vector<1x2x16xbf16>
    %190 = vector.shape_cast %189 : vector<1x2x16xbf16> to vector<2x16xbf16>
    %cst_72 = arith.constant dense<0.000000e+00> : vector<2x128xf32>
    %191 = tpu.matmul %190, %3, %cst_72 {dimension_numbers = #tpu.dot_dimension_numbers<[1], [0], [0], [1], [0, 0, 1, 1], [], []>} : vector<2x16xbf16>, vector<16x128xbf16>, vector<2x128xf32> -> vector<2x128xf32>
    %192 = vector.broadcast %5 : vector<1x128xf32> to vector<2x128xf32>
    %193 = arith.addf %191, %192 : vector<2x128xf32>
    %194 = arith.truncf %182 : vector<2x32xf32> to vector<2x32xbf16>
    %cst_73 = arith.constant dense<0.000000e+00> : vector<2x128xf32>
    %195 = tpu.matmul %194, %4, %cst_73 {dimension_numbers = #tpu.dot_dimension_numbers<[1], [0], [0], [1], [0, 0, 1, 1], [], []>} : vector<2x32xbf16>, vector<32x128xbf16>, vector<2x128xf32> -> vector<2x128xf32>
    %196 = arith.addf %193, %195 : vector<2x128xf32>
    %197 = vector.extract_strided_slice %196 {offsets = [0, 0], sizes = [2, 32], strides = [1, 1]} : vector<2x128xf32> to vector<2x32xf32>
    %cst_74 = arith.constant 5.000000e-01 : f32
    %198 = vector.broadcast %cst_74 : f32 to vector<2x32xf32>
    %199 = arith.mulf %198, %197 : vector<2x32xf32>
    %200 = math.tanh %199 : vector<2x32xf32>
    %cst_75 = arith.constant 5.000000e-01 : f32
    %201 = vector.broadcast %cst_75 : f32 to vector<2x32xf32>
    %202 = arith.mulf %201, %200 : vector<2x32xf32>
    %cst_76 = arith.constant 5.000000e-01 : f32
    %203 = vector.broadcast %cst_76 : f32 to vector<2x32xf32>
    %204 = arith.addf %202, %203 : vector<2x32xf32>
    %205 = vector.extract_strided_slice %196 {offsets = [0, 32], sizes = [2, 32], strides = [1, 1]} : vector<2x128xf32> to vector<2x32xf32>
    %cst_77 = arith.constant 5.000000e-01 : f32
    %206 = vector.broadcast %cst_77 : f32 to vector<2x32xf32>
    %207 = arith.mulf %206, %205 : vector<2x32xf32>
    %208 = math.tanh %207 : vector<2x32xf32>
    %cst_78 = arith.constant 5.000000e-01 : f32
    %209 = vector.broadcast %cst_78 : f32 to vector<2x32xf32>
    %210 = arith.mulf %209, %208 : vector<2x32xf32>
    %cst_79 = arith.constant 5.000000e-01 : f32
    %211 = vector.broadcast %cst_79 : f32 to vector<2x32xf32>
    %212 = arith.addf %210, %211 : vector<2x32xf32>
    %213 = vector.extract_strided_slice %196 {offsets = [0, 64], sizes = [2, 32], strides = [1, 1]} : vector<2x128xf32> to vector<2x32xf32>
    %214 = math.tanh %213 : vector<2x32xf32>
    %215 = vector.extract_strided_slice %196 {offsets = [0, 96], sizes = [2, 32], strides = [1, 1]} : vector<2x128xf32> to vector<2x32xf32>
    %cst_80 = arith.constant 5.000000e-01 : f32
    %216 = vector.broadcast %cst_80 : f32 to vector<2x32xf32>
    %217 = arith.mulf %216, %215 : vector<2x32xf32>
    %218 = math.tanh %217 : vector<2x32xf32>
    %cst_81 = arith.constant 5.000000e-01 : f32
    %219 = vector.broadcast %cst_81 : f32 to vector<2x32xf32>
    %220 = arith.mulf %219, %218 : vector<2x32xf32>
    %cst_82 = arith.constant 5.000000e-01 : f32
    %221 = vector.broadcast %cst_82 : f32 to vector<2x32xf32>
    %222 = arith.addf %220, %221 : vector<2x32xf32>
    %223 = arith.mulf %212, %180 : vector<2x32xf32>
    %224 = arith.mulf %204, %214 : vector<2x32xf32>
    %225 = arith.addf %223, %224 : vector<2x32xf32>
    %226 = math.tanh %225 : vector<2x32xf32>
    %227 = arith.mulf %222, %226 : vector<2x32xf32>
    %228 = arith.truncf %227 : vector<2x32xf32> to vector<2x32xbf16>
    %229 = arith.index_cast %c4_i32 : i32 to index
    %c0_83 = arith.constant 0 : index
    %c0_84 = arith.constant 0 : index
    %230 = vector.load %arg6[%229, %c0_83, %c0_84] : memref<8x2x32xbf16, #tpu.memory_space<vmem>>, vector<1x2x32xbf16>
    %231 = vector.shape_cast %230 : vector<1x2x32xbf16> to vector<2x32xbf16>
    %232 = vector.shape_cast %228 : vector<2x32xbf16> to vector<1x2x32xbf16>
    tpu.vector_store %arg6[%229, %c0_83, %c0_84], %232 {strides = array<i32>} : memref<8x2x32xbf16, #tpu.memory_space<vmem>>, vector<1x2x32xbf16>,
    %c5_i32 = arith.constant 5 : i32
    %233 = arith.index_cast %c5_i32 : i32 to index
    %c0_85 = arith.constant 0 : index
    %c0_86 = arith.constant 0 : index
    %234 = vector.load %arg2[%233, %c0_85, %c0_86] : memref<8x2x16xbf16, #tpu.memory_space<vmem>>, vector<1x2x16xbf16>
    %235 = vector.shape_cast %234 : vector<1x2x16xbf16> to vector<2x16xbf16>
    %cst_87 = arith.constant dense<0.000000e+00> : vector<2x128xf32>
    %236 = tpu.matmul %235, %3, %cst_87 {dimension_numbers = #tpu.dot_dimension_numbers<[1], [0], [0], [1], [0, 0, 1, 1], [], []>} : vector<2x16xbf16>, vector<16x128xbf16>, vector<2x128xf32> -> vector<2x128xf32>
    %237 = vector.broadcast %5 : vector<1x128xf32> to vector<2x128xf32>
    %238 = arith.addf %236, %237 : vector<2x128xf32>
    %239 = arith.truncf %227 : vector<2x32xf32> to vector<2x32xbf16>
    %cst_88 = arith.constant dense<0.000000e+00> : vector<2x128xf32>
    %240 = tpu.matmul %239, %4, %cst_88 {dimension_numbers = #tpu.dot_dimension_numbers<[1], [0], [0], [1], [0, 0, 1, 1], [], []>} : vector<2x32xbf16>, vector<32x128xbf16>, vector<2x128xf32> -> vector<2x128xf32>
    %241 = arith.addf %238, %240 : vector<2x128xf32>
    %242 = vector.extract_strided_slice %241 {offsets = [0, 0], sizes = [2, 32], strides = [1, 1]} : vector<2x128xf32> to vector<2x32xf32>
    %cst_89 = arith.constant 5.000000e-01 : f32
    %243 = vector.broadcast %cst_89 : f32 to vector<2x32xf32>
    %244 = arith.mulf %243, %242 : vector<2x32xf32>
    %245 = math.tanh %244 : vector<2x32xf32>
    %cst_90 = arith.constant 5.000000e-01 : f32
    %246 = vector.broadcast %cst_90 : f32 to vector<2x32xf32>
    %247 = arith.mulf %246, %245 : vector<2x32xf32>
    %cst_91 = arith.constant 5.000000e-01 : f32
    %248 = vector.broadcast %cst_91 : f32 to vector<2x32xf32>
    %249 = arith.addf %247, %248 : vector<2x32xf32>
    %250 = vector.extract_strided_slice %241 {offsets = [0, 32], sizes = [2, 32], strides = [1, 1]} : vector<2x128xf32> to vector<2x32xf32>
    %cst_92 = arith.constant 5.000000e-01 : f32
    %251 = vector.broadcast %cst_92 : f32 to vector<2x32xf32>
    %252 = arith.mulf %251, %250 : vector<2x32xf32>
    %253 = math.tanh %252 : vector<2x32xf32>
    %cst_93 = arith.constant 5.000000e-01 : f32
    %254 = vector.broadcast %cst_93 : f32 to vector<2x32xf32>
    %255 = arith.mulf %254, %253 : vector<2x32xf32>
    %cst_94 = arith.constant 5.000000e-01 : f32
    %256 = vector.broadcast %cst_94 : f32 to vector<2x32xf32>
    %257 = arith.addf %255, %256 : vector<2x32xf32>
    %258 = vector.extract_strided_slice %241 {offsets = [0, 64], sizes = [2, 32], strides = [1, 1]} : vector<2x128xf32> to vector<2x32xf32>
    %259 = math.tanh %258 : vector<2x32xf32>
    %260 = vector.extract_strided_slice %241 {offsets = [0, 96], sizes = [2, 32], strides = [1, 1]} : vector<2x128xf32> to vector<2x32xf32>
    %cst_95 = arith.constant 5.000000e-01 : f32
    %261 = vector.broadcast %cst_95 : f32 to vector<2x32xf32>
    %262 = arith.mulf %261, %260 : vector<2x32xf32>
    %263 = math.tanh %262 : vector<2x32xf32>
    %cst_96 = arith.constant 5.000000e-01 : f32
    %264 = vector.broadcast %cst_96 : f32 to vector<2x32xf32>
    %265 = arith.mulf %264, %263 : vector<2x32xf32>
    %cst_97 = arith.constant 5.000000e-01 : f32
    %266 = vector.broadcast %cst_97 : f32 to vector<2x32xf32>
    %267 = arith.addf %265, %266 : vector<2x32xf32>
    %268 = arith.mulf %257, %225 : vector<2x32xf32>
    %269 = arith.mulf %249, %259 : vector<2x32xf32>
    %270 = arith.addf %268, %269 : vector<2x32xf32>
    %271 = math.tanh %270 : vector<2x32xf32>
    %272 = arith.mulf %267, %271 : vector<2x32xf32>
    %273 = arith.truncf %272 : vector<2x32xf32> to vector<2x32xbf16>
    %274 = arith.index_cast %c5_i32 : i32 to index
    %c0_98 = arith.constant 0 : index
    %c0_99 = arith.constant 0 : index
    %275 = vector.load %arg6[%274, %c0_98, %c0_99] : memref<8x2x32xbf16, #tpu.memory_space<vmem>>, vector<1x2x32xbf16>
    %276 = vector.shape_cast %275 : vector<1x2x32xbf16> to vector<2x32xbf16>
    %277 = vector.shape_cast %273 : vector<2x32xbf16> to vector<1x2x32xbf16>
    tpu.vector_store %arg6[%274, %c0_98, %c0_99], %277 {strides = array<i32>} : memref<8x2x32xbf16, #tpu.memory_space<vmem>>, vector<1x2x32xbf16>,
    %c6_i32 = arith.constant 6 : i32
    %278 = arith.index_cast %c6_i32 : i32 to index
    %c0_100 = arith.constant 0 : index
    %c0_101 = arith.constant 0 : index
    %279 = vector.load %arg2[%278, %c0_100, %c0_101] : memref<8x2x16xbf16, #tpu.memory_space<vmem>>, vector<1x2x16xbf16>
    %280 = vector.shape_cast %279 : vector<1x2x16xbf16> to vector<2x16xbf16>
    %cst_102 = arith.constant dense<0.000000e+00> : vector<2x128xf32>
    %281 = tpu.matmul %280, %3, %cst_102 {dimension_numbers = #tpu.dot_dimension_numbers<[1], [0], [0], [1], [0, 0, 1, 1], [], []>} : vector<2x16xbf16>, vector<16x128xbf16>, vector<2x128xf32> -> vector<2x128xf32>
    %282 = vector.broadcast %5 : vector<1x128xf32> to vector<2x128xf32>
    %283 = arith.addf %281, %282 : vector<2x128xf32>
    %284 = arith.truncf %272 : vector<2x32xf32> to vector<2x32xbf16>
    %cst_103 = arith.constant dense<0.000000e+00> : vector<2x128xf32>
    %285 = tpu.matmul %284, %4, %cst_103 {dimension_numbers = #tpu.dot_dimension_numbers<[1], [0], [0], [1], [0, 0, 1, 1], [], []>} : vector<2x32xbf16>, vector<32x128xbf16>, vector<2x128xf32> -> vector<2x128xf32>
    %286 = arith.addf %283, %285 : vector<2x128xf32>
    %287 = vector.extract_strided_slice %286 {offsets = [0, 0], sizes = [2, 32], strides = [1, 1]} : vector<2x128xf32> to vector<2x32xf32>
    %cst_104 = arith.constant 5.000000e-01 : f32
    %288 = vector.broadcast %cst_104 : f32 to vector<2x32xf32>
    %289 = arith.mulf %288, %287 : vector<2x32xf32>
    %290 = math.tanh %289 : vector<2x32xf32>
    %cst_105 = arith.constant 5.000000e-01 : f32
    %291 = vector.broadcast %cst_105 : f32 to vector<2x32xf32>
    %292 = arith.mulf %291, %290 : vector<2x32xf32>
    %cst_106 = arith.constant 5.000000e-01 : f32
    %293 = vector.broadcast %cst_106 : f32 to vector<2x32xf32>
    %294 = arith.addf %292, %293 : vector<2x32xf32>
    %295 = vector.extract_strided_slice %286 {offsets = [0, 32], sizes = [2, 32], strides = [1, 1]} : vector<2x128xf32> to vector<2x32xf32>
    %cst_107 = arith.constant 5.000000e-01 : f32
    %296 = vector.broadcast %cst_107 : f32 to vector<2x32xf32>
    %297 = arith.mulf %296, %295 : vector<2x32xf32>
    %298 = math.tanh %297 : vector<2x32xf32>
    %cst_108 = arith.constant 5.000000e-01 : f32
    %299 = vector.broadcast %cst_108 : f32 to vector<2x32xf32>
    %300 = arith.mulf %299, %298 : vector<2x32xf32>
    %cst_109 = arith.constant 5.000000e-01 : f32
    %301 = vector.broadcast %cst_109 : f32 to vector<2x32xf32>
    %302 = arith.addf %300, %301 : vector<2x32xf32>
    %303 = vector.extract_strided_slice %286 {offsets = [0, 64], sizes = [2, 32], strides = [1, 1]} : vector<2x128xf32> to vector<2x32xf32>
    %304 = math.tanh %303 : vector<2x32xf32>
    %305 = vector.extract_strided_slice %286 {offsets = [0, 96], sizes = [2, 32], strides = [1, 1]} : vector<2x128xf32> to vector<2x32xf32>
    %cst_110 = arith.constant 5.000000e-01 : f32
    %306 = vector.broadcast %cst_110 : f32 to vector<2x32xf32>
    %307 = arith.mulf %306, %305 : vector<2x32xf32>
    %308 = math.tanh %307 : vector<2x32xf32>
    %cst_111 = arith.constant 5.000000e-01 : f32
    %309 = vector.broadcast %cst_111 : f32 to vector<2x32xf32>
    %310 = arith.mulf %309, %308 : vector<2x32xf32>
    %cst_112 = arith.constant 5.000000e-01 : f32
    %311 = vector.broadcast %cst_112 : f32 to vector<2x32xf32>
    %312 = arith.addf %310, %311 : vector<2x32xf32>
    %313 = arith.mulf %302, %270 : vector<2x32xf32>
    %314 = arith.mulf %294, %304 : vector<2x32xf32>
    %315 = arith.addf %313, %314 : vector<2x32xf32>
    %316 = math.tanh %315 : vector<2x32xf32>
    %317 = arith.mulf %312, %316 : vector<2x32xf32>
    %318 = arith.truncf %317 : vector<2x32xf32> to vector<2x32xbf16>
    %319 = arith.index_cast %c6_i32 : i32 to index
    %c0_113 = arith.constant 0 : index
    %c0_114 = arith.constant 0 : index
    %320 = vector.load %arg6[%319, %c0_113, %c0_114] : memref<8x2x32xbf16, #tpu.memory_space<vmem>>, vector<1x2x32xbf16>
    %321 = vector.shape_cast %320 : vector<1x2x32xbf16> to vector<2x32xbf16>
    %322 = vector.shape_cast %318 : vector<2x32xbf16> to vector<1x2x32xbf16>
    tpu.vector_store %arg6[%319, %c0_113, %c0_114], %322 {strides = array<i32>} : memref<8x2x32xbf16, #tpu.memory_space<vmem>>, vector<1x2x32xbf16>,
    %c7_i32 = arith.constant 7 : i32
    %323 = arith.index_cast %c7_i32 : i32 to index
    %c0_115 = arith.constant 0 : index
    %c0_116 = arith.constant 0 : index
    %324 = vector.load %arg2[%323, %c0_115, %c0_116] : memref<8x2x16xbf16, #tpu.memory_space<vmem>>, vector<1x2x16xbf16>
    %325 = vector.shape_cast %324 : vector<1x2x16xbf16> to vector<2x16xbf16>
    %cst_117 = arith.constant dense<0.000000e+00> : vector<2x128xf32>
    %326 = tpu.matmul %325, %3, %cst_117 {dimension_numbers = #tpu.dot_dimension_numbers<[1], [0], [0], [1], [0, 0, 1, 1], [], []>} : vector<2x16xbf16>, vector<16x128xbf16>, vector<2x128xf32> -> vector<2x128xf32>
    %327 = vector.broadcast %5 : vector<1x128xf32> to vector<2x128xf32>
    %328 = arith.addf %326, %327 : vector<2x128xf32>
    %329 = arith.truncf %317 : vector<2x32xf32> to vector<2x32xbf16>
    %cst_118 = arith.constant dense<0.000000e+00> : vector<2x128xf32>
    %330 = tpu.matmul %329, %4, %cst_118 {dimension_numbers = #tpu.dot_dimension_numbers<[1], [0], [0], [1], [0, 0, 1, 1], [], []>} : vector<2x32xbf16>, vector<32x128xbf16>, vector<2x128xf32> -> vector<2x128xf32>
    %331 = arith.addf %328, %330 : vector<2x128xf32>
    %332 = vector.extract_strided_slice %331 {offsets = [0, 0], sizes = [2, 32], strides = [1, 1]} : vector<2x128xf32> to vector<2x32xf32>
    %cst_119 = arith.constant 5.000000e-01 : f32
    %333 = vector.broadcast %cst_119 : f32 to vector<2x32xf32>
    %334 = arith.mulf %333, %332 : vector<2x32xf32>
    %335 = math.tanh %334 : vector<2x32xf32>
    %cst_120 = arith.constant 5.000000e-01 : f32
    %336 = vector.broadcast %cst_120 : f32 to vector<2x32xf32>
    %337 = arith.mulf %336, %335 : vector<2x32xf32>
    %cst_121 = arith.constant 5.000000e-01 : f32
    %338 = vector.broadcast %cst_121 : f32 to vector<2x32xf32>
    %339 = arith.addf %337, %338 : vector<2x32xf32>
    %340 = vector.extract_strided_slice %331 {offsets = [0, 32], sizes = [2, 32], strides = [1, 1]} : vector<2x128xf32> to vector<2x32xf32>
    %cst_122 = arith.constant 5.000000e-01 : f32
    %341 = vector.broadcast %cst_122 : f32 to vector<2x32xf32>
    %342 = arith.mulf %341, %340 : vector<2x32xf32>
    %343 = math.tanh %342 : vector<2x32xf32>
    %cst_123 = arith.constant 5.000000e-01 : f32
    %344 = vector.broadcast %cst_123 : f32 to vector<2x32xf32>
    %345 = arith.mulf %344, %343 : vector<2x32xf32>
    %cst_124 = arith.constant 5.000000e-01 : f32
    %346 = vector.broadcast %cst_124 : f32 to vector<2x32xf32>
    %347 = arith.addf %345, %346 : vector<2x32xf32>
    %348 = vector.extract_strided_slice %331 {offsets = [0, 64], sizes = [2, 32], strides = [1, 1]} : vector<2x128xf32> to vector<2x32xf32>
    %349 = math.tanh %348 : vector<2x32xf32>
    %350 = vector.extract_strided_slice %331 {offsets = [0, 96], sizes = [2, 32], strides = [1, 1]} : vector<2x128xf32> to vector<2x32xf32>
    %cst_125 = arith.constant 5.000000e-01 : f32
    %351 = vector.broadcast %cst_125 : f32 to vector<2x32xf32>
    %352 = arith.mulf %351, %350 : vector<2x32xf32>
    %353 = math.tanh %352 : vector<2x32xf32>
    %cst_126 = arith.constant 5.000000e-01 : f32
    %354 = vector.broadcast %cst_126 : f32 to vector<2x32xf32>
    %355 = arith.mulf %354, %353 : vector<2x32xf32>
    %cst_127 = arith.constant 5.000000e-01 : f32
    %356 = vector.broadcast %cst_127 : f32 to vector<2x32xf32>
    %357 = arith.addf %355, %356 : vector<2x32xf32>
    %358 = arith.mulf %347, %315 : vector<2x32xf32>
    %359 = arith.mulf %339, %349 : vector<2x32xf32>
    %360 = arith.addf %358, %359 : vector<2x32xf32>
    %361 = math.tanh %360 : vector<2x32xf32>
    %362 = arith.mulf %357, %361 : vector<2x32xf32>
    %363 = arith.truncf %362 : vector<2x32xf32> to vector<2x32xbf16>
    %364 = arith.index_cast %c7_i32 : i32 to index
    %c0_128 = arith.constant 0 : index
    %c0_129 = arith.constant 0 : index
    %365 = vector.load %arg6[%364, %c0_128, %c0_129] : memref<8x2x32xbf16, #tpu.memory_space<vmem>>, vector<1x2x32xbf16>
    %366 = vector.shape_cast %365 : vector<1x2x32xbf16> to vector<2x32xbf16>
    %367 = vector.shape_cast %363 : vector<2x32xbf16> to vector<1x2x32xbf16>
    tpu.vector_store %arg6[%364, %c0_128, %c0_129], %367 {strides = array<i32>} : memref<8x2x32xbf16, #tpu.memory_space<vmem>>, vector<1x2x32xbf16>,
    %c8_i32 = arith.constant 8 : i32
    %c0_130 = arith.constant 0 : index
    %c0_131 = arith.constant 0 : index
    %368 = vector.load %arg7[%c0_130, %c0_131] : memref<2x32xf32, #tpu.memory_space<vmem>>, vector<2x32xf32>
    tpu.vector_store %arg7[%c0_130, %c0_131], %362 {strides = array<i32>} : memref<2x32xf32, #tpu.memory_space<vmem>>, vector<2x32xf32>,
    %c0_132 = arith.constant 0 : index
    %c0_133 = arith.constant 0 : index
    %369 = vector.load %arg8[%c0_132, %c0_133] : memref<2x32xf32, #tpu.memory_space<vmem>>, vector<2x32xf32>
    tpu.vector_store %arg8[%c0_132, %c0_133], %360 {strides = array<i32>} : memref<2x32xf32, #tpu.memory_space<vmem>>, vector<2x32xf32>,
    return
  }
  func.func @transform_0(%arg0: i32, %arg1: i32) -> (i32, i32, i32) {
    %c0_i32 = arith.constant 0 : i32
    %c0_i32_0 = arith.constant 0 : i32
    return %arg1, %arg0, %c0_i32 : i32, i32, i32
  }
  func.func @transform_1(%arg0: i32, %arg1: i32) -> (i32, i32) {
    %c0_i32 = arith.constant 0 : i32
    %c0_i32_0 = arith.constant 0 : i32
    %c0_i32_1 = arith.constant 0 : i32
    return %c0_i32, %c0_i32_0 : i32, i32
  }
  func.func @transform_2(%arg0: i32, %arg1: i32) -> (i32, i32) {
    %c0_i32 = arith.constant 0 : i32
    %c0_i32_0 = arith.constant 0 : i32
    %c0_i32_1 = arith.constant 0 : i32
    return %c0_i32, %c0_i32_0 : i32, i32
  }
  func.func @transform_3(%arg0: i32, %arg1: i32) -> (i32, i32) {
    %c0_i32 = arith.constant 0 : i32
    %c0_i32_0 = arith.constant 0 : i32
    %c0_i32_1 = arith.constant 0 : i32
    return %c0_i32, %c0_i32_0 : i32, i32
  }
  func.func @transform_4(%arg0: i32, %arg1: i32) -> (i32, i32, i32) {
    %c0_i32 = arith.constant 0 : i32
    %c0_i32_0 = arith.constant 0 : i32
    return %arg1, %arg0, %c0_i32 : i32, i32, i32
  }
}

</mosaic_0001>

<bundles_post_ra>
// kernel: tpu_custom_call.1
= control target key start
LH: loop header
LB: loop body
LE: loop exit
PB: predicated region body
PF: predicated region fallthrough
CT: control target
= control target key end

     0   :  { %9 = vsyncpa [#allocation5], 0  ;;  %s1867_s0 = inlined_call_operand.hbm [shape: bf16[8,2,16], index: 0, kind: input, shape index: {}]   ;;  %s1868_s1 = inlined_call_operand.hbm [shape: bf16[16,128], index: 1, kind: input, shape index: {}]   ;;  %s1869_s2 = inlined_call_operand.vmem [shape: f32[1,128], index: 2, kind: input, shape index: {}]   ;;  %s1870_s3 = inlined_call_operand.hbm [shape: bf16[32,128], index: 3, kind: input, shape index: {}]   ;;  %s1871_s4 = inlined_call_operand.hbm [shape: bf16[8,2,32], index: 4, kind: output, shape index: {}]  }
   0x1   :  { %10 = vsyncpa [#allocation8], 0 }
   0x2   :  { %11 = vsyncpa [#allocation6], 0  ;;  %s1575_s15 = smov [#allocation7]   ;;  %s1481_s19 = scalar_lea.hbm %s1868_s1, 128 }
   0x3   :  { %s29_s16 = sshll.u32 %s1575_s15, 4  ;;  %p1482_p0 = scmp.ne.s32.totalorder %s1868_s1, %s1481_s19  ;;  %s30_s16 = int_to_ptr.vmem [resolvable:$true] %s29_s16 }
   0x4   :  { %p1485_p1 = scmp.lt.u32.totalorder %s1481_s19, %s1868_s1 }
   0x6   :  { %p1487_p2 = pnand %p1485_p1, %p1482_p0 }
   0x8   :  { %1490 = shalt.err (!%p1487_p2)
}
   0x9   :  { %s1491_s24 = scalar_lea.vmem %s30_s16, 128  ;;  %p1496_p4 = scmp.lt.s32.totalorder %s30_s16, %s30_s16 }
   0xa   :  { %p1492_p3 = scmp.ne.s32.totalorder %s30_s16, %s1491_s24  ;;  %p1497_p5 = scmp.lt.s32.totalorder %s1491_s24, %s1491_s24 }
   0xc   :  { %p1498_p6 = por %p1497_p5, %p1496_p4 }
   0xe   :  { %p1499_p7 = pnand %p1498_p6, %p1492_p3 }
  0x10   :  { %1502 = shalt.err (!%p1499_p7)
}
  0x11   :  { %s1576_s25 = smov 64   ;;  %s1577_s26 = smov 4  }
  0x12   :  { %35 = dma.hbm_to_vmem [thread:$0]  %s1868_s1, 128, %s30_s16, [#allocation8], %s1576_s25, %s1576_s25, %s1577_s26  }
  0x13   :  { %s1578_s29 = smov [#allocation4]   ;;  %s1503_s7 = scalar_lea.hbm %s1867_s0, 128 }
  0x14   :  { %s17_s30 = sshll.u32 %s1578_s29, 4  ;;  %p1504_p8 = scmp.ne.s32.totalorder %s1867_s0, %s1503_s7  ;;  %s18_s30 = int_to_ptr.vmem [resolvable:$true] %s17_s30 }
  0x15   :  { %p1507_p9 = scmp.lt.u32.totalorder %s1503_s7, %s1867_s0 }
  0x17   :  { %p1509_p10 = pnand %p1507_p9, %p1504_p8 }
  0x19   :  { %1512 = shalt.err (!%p1509_p10)
}
  0x1a   :  { %s1513_s12 = scalar_lea.vmem %s18_s30, 128  ;;  %p1518_p12 = scmp.lt.s32.totalorder %s18_s30, %s18_s30 }
  0x1b   :  { %p1514_p11 = scmp.ne.s32.totalorder %s18_s30, %s1513_s12  ;;  %p1519_p13 = scmp.lt.s32.totalorder %s1513_s12, %s1513_s12 }
  0x1d   :  { %p1520_p0 = por %p1519_p13, %p1518_p12 }
  0x1f   :  { %p1521_p1 = pnand %p1520_p0, %p1514_p11 }
  0x21   :  { %1524 = shalt.err (!%p1521_p1)
}
  0x22   :  { %s1579_s1 = smov 16   ;;  %s1580_s13 = smov 1  }
  0x23   :  { %23 = dma.hbm_to_vmem [thread:$0]  %s1867_s0, 128, %s18_s30, [#allocation5], %s1579_s1, %s1579_s1, %s1580_s13  }
  0x24   :  { %s1581_s16 = smov [#allocation9]   ;;  %s1525_s20 = scalar_lea.hbm %s1870_s3, 256 }
  0x25   :  { %s43_s17 = sshll.u32 %s1581_s16, 4  ;;  %p1526_p2 = scmp.ne.s32.totalorder %s1870_s3, %s1525_s20  ;;  %s44_s17 = int_to_ptr.vmem [resolvable:$true] %s43_s17 }
  0x26   :  { %p1529_p3 = scmp.lt.u32.totalorder %s1525_s20, %s1870_s3 }
  0x28   :  { %p1531_p4 = pnand %p1529_p3, %p1526_p2 }
  0x2a   :  { %1534 = shalt.err (!%p1531_p4)
}
  0x2b   :  { %s1535_s27 = scalar_lea.vmem %s44_s17, 256  ;;  %p1540_p6 = scmp.lt.s32.totalorder %s44_s17, %s44_s17 }
  0x2c   :  { %p1536_p5 = scmp.ne.s32.totalorder %s44_s17, %s1535_s27  ;;  %p1541_p7 = scmp.lt.s32.totalorder %s1535_s27, %s1535_s27 }
  0x2e   :  { %p1542_p8 = por %p1541_p7, %p1540_p6 }
  0x30   :  { %p1543_p9 = pnand %p1542_p8, %p1536_p5 }
  0x32   :  { %1546 = shalt.err (!%p1543_p9)
}
  0x33   :  { %49 = dma.hbm_to_vmem [thread:$0]  %s1870_s3, 256, %s44_s17, [#allocation8], %s1576_s25, %s1576_s25, %s1577_s26  }
  0x34   :  { %1569 = dma.done.wait [#allocation5], 128  }
  0x35   :  { %1570 = vsyncadd [#allocation5], 4294967168 }
  0x36   :  { %1571 = dma.done.wait [#allocation8], 384  }
  0x37   :  { %1572 = vsyncadd [#allocation8], 4294966912  ;;  %vm64_vm0 = vcmask 254976   ;;  %v1582_v0 = vmov 0.0   ;;  %vm1583_vm1 = vmmov 0   ;;  %v1668_v1 = vld [vmem:[#allocation7] sm:$0xff]  }
  0x38   :  { %1265 = vmatprep.subr.bf16.mxu0 %v1582_v0  ;;  %1267 = vmatprep.mubr.msk.bf16.mxu0 %vm1583_vm1, %v1582_v0  ;;  %65 = vst.msk [vmem:[#allocation2] sm:$0x3] %vm64_vm0, %v1582_v0  ;;  %66 = vst.msk [vmem:[#allocation3] sm:$0x3] %vm64_vm0, %v1582_v0  ;;  %v76_v2 = vld [vmem:[#allocation4] sm:$0x1] }
  0x39   :  { %1279 = vmatprep.subr.bf16.mxu1 %v1582_v0  ;;  %1281 = vmatprep.mubr.msk.bf16.mxu1 %vm1583_vm1, %v1582_v0  ;;  %vm89_vm2 = vcmask 130048   ;;  %v1671_v3 = vld [vmem:[#allocation9] sm:$0xff]   ;;  %v1678_v4 = vld [vmem:[#allocation9 + $0x8] sm:$0xff]   ;;  %vm146_vm3 = vcmask 261120   ;;  %s1584_s29 = smov 32   ;;  %vm236_vm4 = vcmask 253952  }
  0x3a   :  { %1266 = vmatpush3.bf16.msra.mxu0 %v1668_v1  ;;  %1280 = vmatpush3.bf16.msra.mxu1 %v1668_v1  ;;  %v1693_v7 = vld [vmem:[%s1869_s2] ss:$0 sm:$0xff]  ;;  %v239_v25 = vld [vmem:[#allocation4 + $0x1] sm:$0x1]  ;;  %v373_v46 = vld [vmem:[#allocation4 + $0x2] sm:$0x1] }
  0x3b   :  { %1271 = vmatprep.subr.bf16.mxu0 %v1582_v0  ;;  %1285 = vmatprep.subr.bf16.mxu1 %v1582_v0  ;;  %s1586_s2 = smov 96  }
  0x3d   :  { %1268 = vmatmul.mubr.msk.bf16.vlgmr.msra.gmra.mrb[0].mxu0 %vm89_vm2, %v76_v2  ;;  %1282 = vmatmul.mubr.msk.bf16.vlgmr.msra.gmra.mrb[0].mxu1 %vm89_vm2, %v239_v25 }
  0x3e   :  { %1272 = vmatpush3.bf16.msra.mxu0 %v1671_v3  ;;  %1275 = vmatprep.mubr.msk.bf16.mxu0 %vm1583_vm1, %v1582_v0 }
  0x3f   :  { %1273 = vmatprep.subr.bf16.mxu0 %v1582_v0  ;;  %v74_v5 = vld [vmem:[#allocation2] sm:$0x3]  ;;  %v75_v14 = vld [vmem:[#allocation3] sm:$0x3]  ;;  %1286 = vmatpush3.bf16.msra.mxu1 %v1671_v3 }
  0x40   :  { %v133_v6 = vpack.c.bf16 %v74_v5, %v74_v5  ;;  %1289 = vmatprep.mubr.msk.bf16.mxu1 %vm1583_vm1, %v1582_v0  ;;  %1287 = vmatprep.subr.bf16.mxu1 %v1582_v0 }
  0x42   :  { %1274 = vmatpush3.bf16.msra.mxu0 %v1678_v4 }
  0x43   :  { %1293 = vmatprep.subr.bf16.mxu0 %v1582_v0  ;;  %1288 = vmatpush3.bf16.msra.mxu1 %v1678_v4 }
  0x44   :  { %1307 = vmatprep.subr.bf16.mxu1 %v1582_v0 }
  0x49   :  { %1276 = vmatmul.mubr.msk.bf16.vlgmr.msra.gmra.mrb[0].mxu0 %vm146_vm3, %v133_v6 }
  0x4a   :  { %1294 = vmatpush3.bf16.msra.mxu0 %v1668_v1  ;;  %1295 = vmatprep.mubr.msk.bf16.mxu0 %vm1583_vm1, %v1582_v0 }
  0x4b   :  { %1299 = vmatprep.subr.bf16.mxu0 %v1582_v0 }
  0x51   :  { %1296 = vmatmul.mubr.msk.bf16.vlgmr.msra.gmra.mrb[4].mxu0 %vm89_vm2, %v373_v46 }
  0x52   :  { %1300 = vmatpush3.bf16.msra.mxu0 %v1671_v3  ;;  %1303 = vmatprep.mubr.msk.bf16.mxu0 %vm1583_vm1, %v1582_v0 }
  0x53   :  { %1301 = vmatprep.subr.bf16.mxu0 %v1582_v0 }
  0x56   :  { %1302 = vmatpush3.bf16.msra.mxu0 %v1678_v4 }
  0x57   :  { %1321 = vmatprep.subr.bf16.mxu0 %v1582_v0 }
 0x11c   :  { %v184_v8 = vpop.f32.mrb[0].mxu0 }
 0x11d   :  { %v1377_v9 = vadd.f32 %v1693_v7, %v184_v8  ;;  %v1277_v10 = vpop.f32.mrb[1].mxu0  ;;  %v507_v8 = vld [vmem:[#allocation4 + $0x3] sm:$0x1] }
 0x11e   :  { %v187_v11 = vpop.f32.mrb[2].mxu0 }
 0x11f   :  { %v1278_v12 = vpop.f32.mrb[3].mxu0  ;;  %1433 = vtanh.f32 %v1377_v9  ;;  %v191_v15 = vmul.f32 0.5, %v1377_v9 }
 0x121   :  { %1435 = vtanh.f32 %v191_v15 }
 0x129   :  { %v1434_v13 = vpop.eup %1433 }
 0x12a   :  { %202 = vrot.lane.b32.xlu0 %v1434_v13, %s1576_s25 }
 0x12b   :  { %v1436_v16 = vpop.eup %1435 }
 0x12c   :  { %v193_v17 = vmul.f32 0.5, %v1436_v16 }
 0x12e   :  { %197 = vrot.lane.b32.xlu0 %v75_v14, %s1584_s29  ;;  %v194_v18 = vadd.f32 0.5, %v193_v17 }
 0x19c   :  { %v203_v19 = vpop.permute.xlu0 %202 }
 0x19d   :  { %v205_v20 = vmul.f32 %v203_v19, %v194_v18 }
 0x19f   :  { %207 = vrot.lane.b32.xlu1 %v205_v20, %s1584_s29 }
 0x1a0   :  { %v198_v21 = vpop.permute.xlu0 %197 }
 0x1a1   :  { %v200_v22 = vmul.f32 %v198_v21, %v194_v18 }
 0x211   :  { %v208_v23 = vpop.permute.xlu1 %207 }
 0x212   :  { %v210_v24 = vadd.f32 %v208_v23, %v200_v22 }
 0x214   :  { %1437 = vtanh.f32 %v210_v24 }
 0x21e   :  { %v1438_v26 = vpop.eup %1437 }
 0x21f   :  { %213 = vrot.lane.b32.xlu1 %v1438_v26, %s1576_s25 }
 0x291   :  { %v214_v27 = vpop.permute.xlu1 %213 }
 0x292   :  { %v216_v28 = vmul.f32 %v214_v27, %v194_v18 }
 0x294   :  { %v1707_v29 = vpack.c.bf16 %v216_v28, %v216_v28 }
 0x296   :  { %283 = vrot.lane.b32.xlu0 %v1707_v29, %s1584_s29 }
 0x308   :  { %v284_v30 = vpop.permute.xlu0 %283 }
 0x309   :  { %1290 = vmatmul.mubr.msk.bf16.vlgmr.msra.gmra.mrb[0].mxu1 %vm146_vm3, %v284_v30  ;;  %v641_v30 = vld [vmem:[#allocation4 + $0x4] sm:$0x1] }
 0x30a   :  { %1308 = vmatpush3.bf16.msra.mxu1 %v1668_v1  ;;  %1309 = vmatprep.mubr.msk.bf16.mxu1 %vm1583_vm1, %v1582_v0 }
 0x30b   :  { %1313 = vmatprep.subr.bf16.mxu1 %v1582_v0 }
 0x311   :  { %1310 = vmatmul.mubr.msk.bf16.vlgmr.msra.gmra.mrb[4].mxu1 %vm89_vm2, %v507_v8 }
 0x312   :  { %1314 = vmatpush3.bf16.msra.mxu1 %v1671_v3  ;;  %1317 = vmatprep.mubr.msk.bf16.mxu1 %vm1583_vm1, %v1582_v0 }
 0x313   :  { %1315 = vmatprep.subr.bf16.mxu1 %v1582_v0 }
 0x316   :  { %1316 = vmatpush3.bf16.msra.mxu1 %v1678_v4 }
 0x317   :  { %1335 = vmatprep.subr.bf16.mxu1 %v1582_v0 }
 0x3dc   :  { %v322_v31 = vpop.f32.mrb[0].mxu1 }
 0x3dd   :  { %v1378_v32 = vadd.f32 %v1693_v7, %v322_v31  ;;  %v1291_v33 = vpop.f32.mrb[1].mxu1 }
 0x3de   :  { %v325_v34 = vpop.f32.mrb[2].mxu1 }
 0x3df   :  { %1439 = vtanh.f32 %v1378_v32  ;;  %v1292_v35 = vpop.f32.mrb[3].mxu1  ;;  %v329_v37 = vmul.f32 0.5, %v1378_v32 }
 0x3e1   :  { %1441 = vtanh.f32 %v329_v37 }
 0x3e9   :  { %v1440_v36 = vpop.eup %1439 }
 0x3ea   :  { %336 = vrot.lane.b32.xlu1 %v1440_v36, %s1576_s25 }
 0x3eb   :  { %v1442_v38 = vpop.eup %1441 }
 0x3ec   :  { %v331_v39 = vmul.f32 0.5, %v1442_v38 }
 0x3ee   :  { %v332_v40 = vadd.f32 0.5, %v331_v39 }
 0x3f0   :  { %v334_v43 = vmul.f32 %v332_v40, %v210_v24 }
 0x45c   :  { %v337_v41 = vpop.permute.xlu1 %336 }
 0x45d   :  { %v339_v42 = vmul.f32 %v337_v41, %v332_v40 }
 0x45f   :  { %341 = vrot.lane.b32.xlu0 %v339_v42, %s1584_s29 }
 0x4d1   :  { %v342_v44 = vpop.permute.xlu0 %341 }
 0x4d2   :  { %v344_v45 = vadd.f32 %v342_v44, %v334_v43 }
 0x4d4   :  { %1443 = vtanh.f32 %v344_v45 }
 0x4de   :  { %v1444_v47 = vpop.eup %1443 }
 0x4df   :  { %347 = vrot.lane.b32.xlu1 %v1444_v47, %s1576_s25 }
 0x551   :  { %v348_v48 = vpop.permute.xlu1 %347 }
 0x552   :  { %v350_v49 = vmul.f32 %v348_v48, %v332_v40 }
 0x554   :  { %v1727_v50 = vpack.c.bf16 %v350_v49, %v350_v49 }
 0x556   :  { %417 = vrot.lane.b32.xlu0 %v1727_v50, %s1584_s29 }
 0x5c8   :  { %v418_v51 = vpop.permute.xlu0 %417 }
 0x5c9   :  { %1304 = vmatmul.mubr.msk.bf16.vlgmr.msra.gmra.mrb[4].mxu0 %vm146_vm3, %v418_v51 }
 0x5ca   :  { %1322 = vmatpush3.bf16.msra.mxu0 %v1668_v1  ;;  %1323 = vmatprep.mubr.msk.bf16.mxu0 %vm1583_vm1, %v1582_v0 }
 0x5cb   :  { %1327 = vmatprep.subr.bf16.mxu0 %v1582_v0 }
 0x5d1   :  { %1324 = vmatmul.mubr.msk.bf16.vlgmr.msra.gmra.mrb[8].mxu0 %vm89_vm2, %v641_v30 }
 0x5d2   :  { %1328 = vmatpush3.bf16.msra.mxu0 %v1671_v3  ;;  %1331 = vmatprep.mubr.msk.bf16.mxu0 %vm1583_vm1, %v1582_v0 }
 0x5d3   :  { %1329 = vmatprep.subr.bf16.mxu0 %v1582_v0 }
 0x5d6   :  { %1330 = vmatpush3.bf16.msra.mxu0 %v1678_v4 }
 0x5d7   :  { %1349 = vmatprep.subr.bf16.mxu0 %v1582_v0 }
 0x69c   :  { %v456_v52 = vpop.f32.mrb[4].mxu0 }
 0x69d   :  { %v1379_v53 = vadd.f32 %v1693_v7, %v456_v52  ;;  %v1305_v54 = vpop.f32.mrb[5].mxu0  ;;  %v775_v52 = vld [vmem:[#allocation4 + $0x5] sm:$0x1] }
 0x69e   :  { %v459_v55 = vpop.f32.mrb[6].mxu0 }
 0x69f   :  { %1445 = vtanh.f32 %v1379_v53  ;;  %v1306_v56 = vpop.f32.mrb[7].mxu0  ;;  %v463_v58 = vmul.f32 0.5, %v1379_v53 }
 0x6a1   :  { %1447 = vtanh.f32 %v463_v58 }
 0x6a9   :  { %v1446_v57 = vpop.eup %1445 }
 0x6aa   :  { %470 = vrot.lane.b32.xlu1 %v1446_v57, %s1576_s25 }
 0x6ab   :  { %v1448_v59 = vpop.eup %1447 }
 0x6ac   :  { %v465_v60 = vmul.f32 0.5, %v1448_v59 }
 0x6ae   :  { %v466_v61 = vadd.f32 0.5, %v465_v60 }
 0x6b0   :  { %v468_v2 = vmul.f32 %v466_v61, %v344_v45 }
 0x71c   :  { %v471_v62 = vpop.permute.xlu1 %470 }
 0x71d   :  { %v473_v63 = vmul.f32 %v471_v62, %v466_v61 }
 0x71f   :  { %475 = vrot.lane.b32.xlu0 %v473_v63, %s1584_s29 }
 0x791   :  { %v476_v5 = vpop.permute.xlu0 %475 }
 0x792   :  { %v478_v6 = vadd.f32 %v476_v5, %v468_v2 }
 0x794   :  { %1449 = vtanh.f32 %v478_v6 }
 0x79e   :  { %v1450_v9 = vpop.eup %1449 }
 0x79f   :  { %481 = vrot.lane.b32.xlu1 %v1450_v9, %s1576_s25 }
 0x811   :  { %v482_v10 = vpop.permute.xlu1 %481 }
 0x812   :  { %v484_v11 = vmul.f32 %v482_v10, %v466_v61 }
 0x814   :  { %v1747_v12 = vpack.c.bf16 %v484_v11, %v484_v11 }
 0x816   :  { %551 = vrot.lane.b32.xlu0 %v1747_v12, %s1584_s29 }
 0x888   :  { %v552_v13 = vpop.permute.xlu0 %551 }
 0x889   :  { %1318 = vmatmul.mubr.msk.bf16.vlgmr.msra.gmra.mrb[4].mxu1 %vm146_vm3, %v552_v13 }
 0x88a   :  { %1336 = vmatpush3.bf16.msra.mxu1 %v1668_v1  ;;  %1337 = vmatprep.mubr.msk.bf16.mxu1 %vm1583_vm1, %v1582_v0 }
 0x88b   :  { %1341 = vmatprep.subr.bf16.mxu1 %v1582_v0 }
 0x891   :  { %1338 = vmatmul.mubr.msk.bf16.vlgmr.msra.gmra.mrb[8].mxu1 %vm89_vm2, %v775_v52 }
 0x892   :  { %1342 = vmatpush3.bf16.msra.mxu1 %v1671_v3  ;;  %1345 = vmatprep.mubr.msk.bf16.mxu1 %vm1583_vm1, %v1582_v0 }
 0x893   :  { %1343 = vmatprep.subr.bf16.mxu1 %v1582_v0 }
 0x896   :  { %1344 = vmatpush3.bf16.msra.mxu1 %v1678_v4 }
 0x897   :  { %1363 = vmatprep.subr.bf16.mxu1 %v1582_v0 }
 0x95c   :  { %v590_v14 = vpop.f32.mrb[4].mxu1 }
 0x95d   :  { %v1380_v15 = vadd.f32 %v1693_v7, %v590_v14  ;;  %v1319_v16 = vpop.f32.mrb[5].mxu1  ;;  %v909_v14 = vld [vmem:[#allocation4 + $0x6] sm:$0x1] }
 0x95e   :  { %v593_v17 = vpop.f32.mrb[6].mxu1 }
 0x95f   :  { %1451 = vtanh.f32 %v1380_v15  ;;  %v1320_v18 = vpop.f32.mrb[7].mxu1  ;;  %v597_v20 = vmul.f32 0.5, %v1380_v15 }
 0x961   :  { %1453 = vtanh.f32 %v597_v20 }
 0x969   :  { %v1452_v19 = vpop.eup %1451 }
 0x96a   :  { %604 = vrot.lane.b32.xlu1 %v1452_v19, %s1576_s25 }
 0x96b   :  { %v1454_v21 = vpop.eup %1453 }
 0x96c   :  { %v599_v22 = vmul.f32 0.5, %v1454_v21 }
 0x96e   :  { %v600_v23 = vadd.f32 0.5, %v599_v22 }
 0x970   :  { %v602_v26 = vmul.f32 %v600_v23, %v478_v6 }
 0x9dc   :  { %v605_v24 = vpop.permute.xlu1 %604 }
 0x9dd   :  { %v607_v25 = vmul.f32 %v605_v24, %v600_v23 }
 0x9df   :  { %609 = vrot.lane.b32.xlu0 %v607_v25, %s1584_s29 }
 0xa51   :  { %v610_v27 = vpop.permute.xlu0 %609 }
 0xa52   :  { %v612_v28 = vadd.f32 %v610_v27, %v602_v26 }
 0xa54   :  { %1455 = vtanh.f32 %v612_v28 }
 0xa5e   :  { %v1456_v31 = vpop.eup %1455 }
 0xa5f   :  { %615 = vrot.lane.b32.xlu1 %v1456_v31, %s1576_s25 }
 0xad1   :  { %v616_v32 = vpop.permute.xlu1 %615 }
 0xad2   :  { %v618_v33 = vmul.f32 %v616_v32, %v600_v23 }
 0xad4   :  { %v1767_v34 = vpack.c.bf16 %v618_v33, %v618_v33 }
 0xad6   :  { %685 = vrot.lane.b32.xlu0 %v1767_v34, %s1584_s29 }
 0xb48   :  { %v686_v35 = vpop.permute.xlu0 %685 }
 0xb49   :  { %1332 = vmatmul.mubr.msk.bf16.vlgmr.msra.gmra.mrb[8].mxu0 %vm146_vm3, %v686_v35 }
 0xb4a   :  { %1350 = vmatpush3.bf16.msra.mxu0 %v1668_v1  ;;  %1351 = vmatprep.mubr.msk.bf16.mxu0 %vm1583_vm1, %v1582_v0 }
 0xb4b   :  { %1355 = vmatprep.subr.bf16.mxu0 %v1582_v0 }
 0xb51   :  { %1352 = vmatmul.mubr.msk.bf16.vlgmr.msra.gmra.mrb[12].mxu0 %vm89_vm2, %v909_v14 }
 0xb52   :  { %1356 = vmatpush3.bf16.msra.mxu0 %v1671_v3  ;;  %1359 = vmatprep.mubr.msk.bf16.mxu0 %vm1583_vm1, %v1582_v0 }
 0xb53   :  { %1357 = vmatprep.subr.bf16.mxu0 %v1582_v0 }
 0xb56   :  { %1358 = vmatpush3.bf16.msra.mxu0 %v1678_v4 }
 0xc1c   :  { %v724_v36 = vpop.f32.mrb[8].mxu0 }
 0xc1d   :  { %v1381_v37 = vadd.f32 %v1693_v7, %v724_v36  ;;  %v1333_v38 = vpop.f32.mrb[9].mxu0 }
 0xc1e   :  { %v727_v39 = vpop.f32.mrb[10].mxu0 }
 0xc1f   :  { %1457 = vtanh.f32 %v1381_v37  ;;  %v1334_v40 = vpop.f32.mrb[11].mxu0  ;;  %v731_v42 = vmul.f32 0.5, %v1381_v37  ;;  %v1043_v37 = vld [vmem:[#allocation4 + $0x7] sm:$0x1] }
 0xc21   :  { %1459 = vtanh.f32 %v731_v42 }
 0xc29   :  { %v1458_v41 = vpop.eup %1457 }
 0xc2a   :  { %738 = vrot.lane.b32.xlu1 %v1458_v41, %s1576_s25 }
 0xc2b   :  { %v1460_v43 = vpop.eup %1459 }
 0xc2c   :  { %v733_v44 = vmul.f32 0.5, %v1460_v43 }
 0xc2e   :  { %v734_v45 = vadd.f32 0.5, %v733_v44 }
 0xc30   :  { %v736_v48 = vmul.f32 %v734_v45, %v612_v28 }
 0xc9c   :  { %v739_v46 = vpop.permute.xlu1 %738 }
 0xc9d   :  { %v741_v47 = vmul.f32 %v739_v46, %v734_v45 }
 0xc9f   :  { %743 = vrot.lane.b32.xlu0 %v741_v47, %s1584_s29  ;;  %v1585_v47 = vmov 1966171168  }
 0xd11   :  { %v744_v49 = vpop.permute.xlu0 %743 }
 0xd12   :  { %v746_v51 = vadd.f32 %v744_v49, %v736_v48  ;;  %v220_v48 = vunpack.c.l.s4 %v1585_v47  ;;  %v222_v49 = vlaneseq }
 0xd14   :  { %1461 = vtanh.f32 %v746_v51  ;;  %v221_v52 = vunpack.c.0.s8 %v220_v48 }
 0xd1e   :  { %v1462_v53 = vpop.eup %1461 }
 0xd1f   :  { %749 = vrot.lane.b32.xlu1 %v1462_v53, %s1576_s25  ;;  %v223_v53 = vshrl.u32 %v222_v49, 7 }
 0xd91   :  { %v750_v54 = vpop.permute.xlu1 %749 }
 0xd92   :  { %v752_v55 = vmul.f32 %v750_v54, %v734_v45 }
 0xd94   :  { %v1787_v56 = vpack.c.bf16 %v752_v55, %v752_v55  ;;  %v224_v55 = vsub.s32 %v221_v52, %v223_v53 }
 0xd96   :  { %819 = vrot.lane.b32.xlu0 %v1787_v56, %s1584_s29 }
 0xe08   :  { %v820_v57 = vpop.permute.xlu0 %819 }
 0xe09   :  { %1346 = vmatmul.mubr.msk.bf16.vlgmr.msra.gmra.mrb[8].mxu1 %vm146_vm3, %v820_v57 }
 0xe0a   :  { %1364 = vmatpush3.bf16.msra.mxu1 %v1668_v1  ;;  %1365 = vmatprep.mubr.msk.bf16.mxu1 %vm1583_vm1, %v1582_v0 }
 0xe0b   :  { %1369 = vmatprep.subr.bf16.mxu1 %v1582_v0 }
 0xe11   :  { %1366 = vmatmul.mubr.msk.bf16.vlgmr.msra.gmra.mrb[12].mxu1 %vm89_vm2, %v1043_v37 }
 0xe12   :  { %1370 = vmatpush3.bf16.msra.mxu1 %v1671_v3  ;;  %1373 = vmatprep.mubr.msk.bf16.mxu1 %vm1583_vm1, %v1582_v0 }
 0xe13   :  { %1371 = vmatprep.subr.bf16.mxu1 %v1582_v0 }
 0xe16   :  { %1372 = vmatpush3.bf16.msra.mxu1 %v1678_v4 }
 0xedc   :  { %v858_v58 = vpop.f32.mrb[8].mxu1 }
 0xedd   :  { %v1382_v59 = vadd.f32 %v1693_v7, %v858_v58  ;;  %v1347_v60 = vpop.f32.mrb[9].mxu1 }
 0xede   :  { %v861_v61 = vpop.f32.mrb[10].mxu1  ;;  %v493_v60 = vrot.slane %v1747_v12, %v224_v55 }
 0xedf   :  { %1463 = vtanh.f32 %v1382_v59  ;;  %v1348_v62 = vpop.f32.mrb[11].mxu1  ;;  %v865_v2 = vmul.f32 0.5, %v1382_v59 }
 0xee0   :  { %v761_v62 = vrot.slane %v1787_v56, %v224_v55  ;;  %v359_v56 = vrot.slane %v1727_v50, %v224_v55 }
 0xee1   :  { %1465 = vtanh.f32 %v865_v2 }
 0xee9   :  { %v1464_v63 = vpop.eup %1463 }
 0xeea   :  { %872 = vrot.lane.b32.xlu1 %v1464_v63, %s1576_s25  ;;  %v500_v63 = vrot.slane %v493_v60, %v224_v55 }
 0xeeb   :  { %v1466_v5 = vpop.eup %1465 }
 0xeec   :  { %v867_v6 = vmul.f32 0.5, %v1466_v5  ;;  %v768_v5 = vrot.slane %v761_v62, %v224_v55 }
 0xeee   :  { %v868_v1 = vadd.f32 0.5, %v867_v6 }
 0xef0   :  { %v870_v10 = vmul.f32 %v868_v1, %v746_v51 }
 0xf5c   :  { %v873_v8 = vpop.permute.xlu1 %872 }
 0xf5d   :  { %v875_v9 = vmul.f32 %v873_v8, %v868_v1 }
 0xf5f   :  { %877 = vrot.lane.b32.xlu0 %v875_v9, %s1584_s29 }
 0xfd1   :  { %v878_v11 = vpop.permute.xlu0 %877 }
 0xfd2   :  { %v880_v13 = vadd.f32 %v878_v11, %v870_v10 }
 0xfd4   :  { %1467 = vtanh.f32 %v880_v13 }
 0xfde   :  { %v1468_v15 = vpop.eup %1467 }
 0xfdf   :  { %883 = vrot.lane.b32.xlu1 %v1468_v15, %s1576_s25  ;;  %v366_v15 = vrot.slane %v359_v56, %v224_v55 }
0x1051   :  { %v884_v16 = vpop.permute.xlu1 %883 }
0x1052   :  { %v886_v17 = vmul.f32 %v884_v16, %v868_v1 }
0x1054   :  { %v1806_v18 = vpack.c.bf16 %v886_v17, %v886_v17 }
0x1056   :  { %953 = vrot.lane.b32.xlu0 %v1806_v18, %s1584_s29  ;;  %v895_v16 = vrot.slane %v1806_v18, %v224_v55 }
0x1058   :  { %v902_v50 = vrot.slane %v895_v16, %v224_v55 }
0x10c8   :  { %v954_v19 = vpop.permute.xlu0 %953 }
0x10c9   :  { %1360 = vmatmul.mubr.msk.bf16.vlgmr.msra.gmra.mrb[12].mxu0 %vm146_vm3, %v954_v19 }
0x119c   :  { %v992_v20 = vpop.f32.mrb[12].mxu0 }
0x119d   :  { %v1383_v21 = vadd.f32 %v1693_v7, %v992_v20  ;;  %v1361_v22 = vpop.f32.mrb[13].mxu0 }
0x119e   :  { %v995_v23 = vpop.f32.mrb[14].mxu0 }
0x119f   :  { %1469 = vtanh.f32 %v1383_v21  ;;  %v1362_v24 = vpop.f32.mrb[15].mxu0  ;;  %v999_v26 = vmul.f32 0.5, %v1383_v21 }
0x11a1   :  { %1471 = vtanh.f32 %v999_v26 }
0x11a9   :  { %v1470_v25 = vpop.eup %1469 }
0x11aa   :  { %1006 = vrot.lane.b32.xlu1 %v1470_v25, %s1576_s25 }
0x11ab   :  { %v1472_v27 = vpop.eup %1471 }
0x11ac   :  { %v1001_v28 = vmul.f32 0.5, %v1472_v27 }
0x11ae   :  { %v1002_v30 = vadd.f32 0.5, %v1001_v28 }
0x11b0   :  { %v1004_v33 = vmul.f32 %v1002_v30, %v880_v13  ;;  %v627_v13 = vrot.slane %v1767_v34, %v224_v55 }
0x11b2   :  { %v634_v17 = vrot.slane %v627_v13, %v224_v55 }
0x121c   :  { %v1007_v31 = vpop.permute.xlu1 %1006 }
0x121d   :  { %v1009_v32 = vmul.f32 %v1007_v31, %v1002_v30 }
0x121f   :  { %1011 = vrot.lane.b32.xlu0 %v1009_v32, %s1584_s29 }
0x1291   :  { %v1012_v35 = vpop.permute.xlu0 %1011 }
0x1292   :  { %v1014_v36 = vadd.f32 %v1012_v35, %v1004_v33 }
0x1294   :  { %1473 = vtanh.f32 %v1014_v36 }
0x129e   :  { %v1474_v38 = vpop.eup %1473 }
0x129f   :  { %1017 = vrot.lane.b32.xlu1 %v1474_v38, %s1576_s25 }
0x1311   :  { %v1018_v39 = vpop.permute.xlu1 %1017 }
0x1312   :  { %v1020_v40 = vmul.f32 %v1018_v39, %v1002_v30 }
0x1314   :  { %v1021_v41 = vpack.c.bf16 %v1020_v40, %v1020_v40 }
0x1316   :  { %1087 = vrot.lane.b32.xlu0 %v1021_v41, %s1584_s29  ;;  %v1029_v2 = vrot.slane %v1021_v41, %v224_v55 }
0x1318   :  { %v1036_v6 = vrot.slane %v1029_v2, %v224_v55 }
0x1388   :  { %v1088_v42 = vpop.permute.xlu0 %1087 }
0x1389   :  { %1374 = vmatmul.mubr.msk.bf16.vlgmr.msra.gmra.mrb[12].mxu1 %vm146_vm3, %v1088_v42 }
0x145c   :  { %v1126_v43 = vpop.f32.mrb[12].mxu1 }
0x145d   :  { %v1384_v3 = vadd.f32 %v1693_v7, %v1126_v43  ;;  %v1375_v44 = vpop.f32.mrb[13].mxu1  ;;  %v225_v7 = vrot.slane %v1707_v29, %v224_v55 }
0x145e   :  { %v1129_v45 = vpop.f32.mrb[14].mxu1 }
0x145f   :  { %1475 = vtanh.f32 %v1384_v3  ;;  %v1376_v0 = vpop.f32.mrb[15].mxu1  ;;  %v1133_v4 = vmul.f32 0.5, %v1384_v3  ;;  %v232_v61 = vrot.slane %v225_v7, %v224_v55 }
0x1461   :  { %1477 = vtanh.f32 %v1133_v4 }
0x1469   :  { %v1476_v46 = vpop.eup %1475 }
0x146a   :  { %1140 = vrot.lane.b32.xlu1 %v1476_v46, %s1576_s25 }
0x146b   :  { %v1478_v51 = vpop.eup %1477 }
0x146c   :  { %v1135_v54 = vmul.f32 0.5, %v1478_v51 }
0x146e   :  { %v1136_v57 = vadd.f32 0.5, %v1135_v54 }
0x1470   :  { %v1138_v29 = vmul.f32 %v1136_v57, %v1014_v36 }
0x14dc   :  { %v1141_v58 = vpop.permute.xlu1 %1140 }
0x14dd   :  { %v1143_v59 = vmul.f32 %v1141_v58, %v1136_v57 }
0x14df   :  { %1145 = vrot.lane.b32.xlu0 %v1143_v59, %s1584_s29 }
0x14e3   :  { %233 = vrot.lane.b32.xlu0 %v232_v61, %s1584_s29 }
0x14e7   :  { %501 = vrot.lane.b32.xlu0 %v500_v63, %s1584_s29 }
0x14eb   :  { %769 = vrot.lane.b32.xlu0 %v768_v5, %s1584_s29 }
0x14ef   :  { %1037 = vrot.lane.b32.xlu0 %v1036_v6, %s1584_s29 }
0x1551   :  { %v1146_v1 = vpop.permute.xlu0 %1145 }
0x1552   :  { %v1148_v8 = vadd.f32 %v1146_v1, %v1138_v29 }
0x1554   :  { %1479 = vtanh.f32 %v1148_v8 }
0x1555   :  { %v234_v12 = vpop.permute.xlu0 %233 }
0x1556   :  { %237 = vst.msk [vmem:[#allocation10] sm:$0x1] %vm236_vm4, %v234_v12 }
0x1559   :  { %v502_v9 = vpop.permute.xlu0 %501 }
0x155a   :  { %505 = vst.msk [vmem:[#allocation10 + $0x2] sm:$0x1] %vm236_vm4, %v502_v9 }
0x155d   :  { %v770_v10 = vpop.permute.xlu0 %769 }
0x155e   :  { %v1480_v11 = vpop.eup %1479  ;;  %773 = vst.msk [vmem:[#allocation10 + $0x4] sm:$0x1] %vm236_vm4, %v770_v10 }
0x155f   :  { %1151 = vrot.lane.b32.xlu1 %v1480_v11, %s1576_s25  ;;  %s1587_s25 = smov [#allocation10]  }
0x1560   :  { %s1192_s30 = sshll.u32 %s1587_s25, 4  ;;  %s1193_s30 = int_to_ptr.vmem [resolvable:$true] %s1192_s30 }
0x1561   :  { %v1038_v14 = vpop.permute.xlu0 %1037  ;;  %s1547_s5 = scalar_lea.vmem %s1193_s30, 128  ;;  %p1552_p11 = scmp.lt.s32.totalorder %s1193_s30, %s1193_s30 }
0x1562   :  { %1041 = vst.msk [vmem:[#allocation10 + $0x6] sm:$0x1] %vm236_vm4, %v1038_v14  ;;  %p1548_p10 = scmp.ne.s32.totalorder %s1193_s30, %s1547_s5  ;;  %p1553_p12 = scmp.lt.s32.totalorder %s1547_s5, %s1547_s5 }
0x1563   :  { %367 = vrot.lane.b32.xlu1 %v366_v15, %s1584_s29 }
0x1564   :  { %p1554_p13 = por %p1553_p12, %p1552_p11 }
0x1566   :  { %p1555_p0 = pnand %p1554_p13, %p1548_p10 }
0x1567   :  { %635 = vrot.lane.b32.xlu1 %v634_v17, %s1584_s29 }
0x156b   :  { %903 = vrot.lane.b32.xlu1 %v902_v50, %s1584_s29 }
0x15d1   :  { %v1152_v19 = vpop.permute.xlu1 %1151 }
0x15d2   :  { %v1154_v20 = vmul.f32 %v1152_v19, %v1136_v57 }
0x15d4   :  { %v1155_v21 = vpack.c.bf16 %v1154_v20, %v1154_v20  ;;  %1177 = vrot.lane.b32.xlu0 %v1154_v20, %s1584_s29 }
0x15d5   :  { %v368_v34 = vpop.permute.xlu1 %367 }
0x15d6   :  { %v1163_v22 = vrot.slane %v1155_v21, %v224_v55  ;;  %371 = vst.msk [vmem:[#allocation10 + $0x1] sm:$0x1] %vm236_vm4, %v368_v34 }
0x15d8   :  { %v1170_v23 = vrot.slane %v1163_v22, %v224_v55 }
0x15d9   :  { %v636_v24 = vpop.permute.xlu1 %635 }
0x15da   :  { %639 = vst.msk [vmem:[#allocation10 + $0x3] sm:$0x1] %vm236_vm4, %v636_v24  ;;  %1171 = vrot.lane.b32.xlu1 %v1170_v23, %s1584_s29 }
0x15dd   :  { %v904_v18 = vpop.permute.xlu1 %903 }
0x15de   :  { %907 = vst.msk [vmem:[#allocation10 + $0x5] sm:$0x1] %vm236_vm4, %v904_v18  ;;  %1183 = vrot.lane.b32.xlu1 %v1148_v8, %s1586_s2 }
0x1646   :  { %v1178_v25 = vpop.permute.xlu0 %1177 }
0x1647   :  { %1181 = vst.msk [vmem:[#allocation2] sm:$0x3] %vm64_vm0, %v1178_v25 }
0x164c   :  { %v1172_v26 = vpop.permute.xlu1 %1171 }
0x164d   :  { %1175 = vst.msk [vmem:[#allocation10 + $0x7] sm:$0x1] %vm236_vm4, %v1172_v26 }
0x164e   :  { %1558 = shalt.err (!%p1555_p0)
}
0x164f   :  { %s1559_s8 = scalar_lea.hbm %s1871_s4, 128 }
0x1650   :  { %p1560_p1 = scmp.ne.s32.totalorder %s1871_s4, %s1559_s8  ;;  %p1563_p2 = scmp.lt.u32.totalorder %s1559_s8, %s1871_s4 }
0x1652   :  { %p1565_p3 = pnand %p1563_p2, %p1560_p1 }
0x1654   :  { %1568 = shalt.err (!%p1565_p3)
}
0x1655   :  { %1198 = dma.vmem_to_hbm [thread:$0]  %s1193_s30, 128, %s1871_s4, [#allocation6], %s1579_s1, %s1579_s1, %s1580_s13   ;;  %v1184_v27 = vpop.permute.xlu1 %1183 }
0x1656   :  { %1186 = vst.msk [vmem:[#allocation3] sm:$0x3] %vm64_vm0, %v1184_v27 }
0x1657   :  { %1573 = dma.done.wait [#allocation6], 128  }
0x1658   :  { %1574 = vsyncadd [#allocation6], 4294967168 }
0x1659   :  { %1202 = vsyncpa [#allocation5], 1 }
0x165a   :  { %1203 = vsyncpa [#allocation8], 1 }
0x165b   :  { %1204 = vsyncpa [#allocation6], 1 }

</bundles_post_ra>
